<compile_context>
chip_gen: v5e
topology: v5e:2x2
jax: 0.10.0
libtpu: 0.0.40
codegen_flags: <defaults>
</compile_context>

<pallas_src>
import functools
import math

import jax
import jax.numpy as jnp
from jax.experimental import pallas as pl
from jax.experimental.pallas import tpu as pltpu


# ----------------------------- Pallas kernel --------------------------------

def magnet_kernel(x_ref, lr_ref, li_ref, w0_ref,
                  w1a_ref, w1b_ref, b1_ref,
                  w2a_ref, w2b_ref, b2_ref,
                  w3a_ref, w3b_ref, b3_ref,
                  w4a_ref, w4b_ref, b4_ref,
                  wfr_ref, wfi_ref,
                  out_ref, *, n):
    """One grid step = one graph (grid axis = batch, 'parallel').

    Activations are row-stacked (2n, C) = [real; imag] for the shared-weight matmuls;
    L_real / L_imag stay separate (n, n) operands (no block-diagonal)."""
    cdt = wfr_ref.dtype   # bf16 on the default/perf path, f32 on the checking path

    def mm(a, b):
        # MXU matmul: operands in the compute dtype (bf16 by default), f32 accumulation.
        # astype is a no-op for the host-pre-cast operands (weights, L, x).
        return jnp.dot(a.astype(cdt), b.astype(cdt), preferred_element_type=jnp.float32)

    x = x_ref[0]          # (n, size_in)
    lr = lr_ref[0]        # (n, n)
    li = li_ref[0]        # (n, n)

    # Input Linear (no bias) is shared by real and imag -> compute once.
    h0 = mm(x, w0_ref[...])                 # (n, hidden), f32
    hr, hi = h0, h0

    for wa_ref, wb_ref, cb_ref in ((w1a_ref, w1b_ref, b1_ref),
                                   (w2a_ref, w2b_ref, b2_ref),
                                   (w3a_ref, w3b_ref, b3_ref),
                                   (w4a_ref, w4b_ref, b4_ref)):
        # K=2 Chebyshev conv: poly = [h, L @ h]; two accumulating matmuls
        # (no lane-axis concat / fused weight -> no per-layer lane relayout).
        hs = jnp.concatenate([hr, hi], axis=0)                        # (2n, Cin) sublane concat
        lh = jnp.concatenate([mm(lr, hr), mm(li, hi)], axis=0)        # (2n, Cin)
        h = mm(hs, wa_ref[...]) + mm(lh, wb_ref[...]) + cb_ref[...]   # (2n, Cout), f32
        # complex ReLU: one mask from the real half, applied to both halves (f32 VPU ops).
        cond = h[:n] >= 0.0
        hr = jnp.where(cond, h[:n], 0.0)
        hi = jnp.where(cond, h[n:], 0.0)
        # TODO(synk): dropout(p=0) in the reference is applied to the overwritten `x`,
        # so it has no effect on the output -> intentionally omitted.

    # Final projection: w_last folded into the split halves of the fresh final Linear;
    # columns zero-padded to 128 lanes -> unmasked, lane-dense stores.
    out_ref[0] = mm(hr, wfr_ref[...]) + mm(hi, wfi_ref[...])


# ------------------------------ wrapper --------------------------------------

def magnet_forward(x, L_real, L_imag, p, *, use_bf16=True):
    """x: (B, N, size_in) or (N, size_in); L_real/L_imag: matching (B, N, N) or (N, N)."""
    squeeze = (x.ndim == 2)
    if squeeze:
        x, L_real, L_imag = x[None], L_real[None], L_imag[None]
    B, N, size_in = x.shape
    hidden = p["w0"].shape[1]
    size_out = p["w_final_r"].shape[1]
    out_lanes = -(-size_out // 128) * 128        # lane-dense output width (multiple of 128)
    assert N % 8 == 0, "pad N to a multiple of 8 so the real/imag split stays tile-aligned"

    # bf16 default path (v6e/v7x MXU-native; set use_bf16=False for bit-tight f32, e.g.
    # if accuracy regressions appear on v5e).
    cdt = jnp.bfloat16 if use_bf16 else jnp.float32

    # --- host-side static folds / casts (free at trace time) ---
    # Fold the output Linear into the split final weights and pad to 128 output lanes.
    wfr = p["w_last"] @ p["w_final_r"]                       # (hidden, size_out)
    wfi = p["w_last"] @ p["w_final_i"]
    pad = ((0, 0), (0, out_lanes - size_out))
    wfr = jnp.pad(wfr, pad)
    wfi = jnp.pad(wfi, pad)

    args, specs = [], []

    def add(a, spec):
        args.append(a)
        specs.append(spec)

    def per_graph(a):   # (B, ...) -> one graph per grid step
        return pl.BlockSpec((1,) + tuple(a.shape[1:]), lambda b: (b, 0, 0))

    def shared(a):      # weights: same block for every grid step (stays resident)
        return pl.BlockSpec(tuple(a.shape), lambda b: (0,) * a.ndim)

    add(x.astype(cdt), per_graph(x))
    add(L_real.astype(cdt), per_graph(L_real))
    add(L_imag.astype(cdt), per_graph(L_imag))
    add(p["w0"].astype(cdt), shared(p["w0"]))
    for i in range(1, 5):
        cw = p[f"cw{i}"]                                     # (K=2, Cin, Cout)
        add(cw[0].astype(cdt), shared(cw[0]))
        add(cw[1].astype(cdt), shared(cw[1]))
        add(p[f"cb{i}"], shared(p[f"cb{i}"]))                # bias stays f32 (f32 VPU add)
    add(wfr.astype(cdt), shared(wfr))
    add(wfi.astype(cdt), shared(wfi))

    # Advisory cost estimate so XLA schedules the custom call sensibly.
    dims = [hidden, hidden // 2, hidden // 4, hidden // 2, hidden]
    flops = 2 * N * size_in * hidden                         # x @ w0 (shared by real/imag)
    for i in range(4):
        cin, cout = dims[i], dims[i + 1]
        flops += 2 * (2 * N * N * cin)                       # Lr@hr and Li@hi
        flops += 2 * (2 * (2 * N) * cin * cout)              # hs@Wa and Lhs@Wb
    flops += 2 * (2 * N * hidden * out_lanes)                # final split projection (padded)
    flops *= B
    bytes_accessed = (sum(int(a.size) * a.dtype.itemsize for a in args)
                      + B * N * out_lanes * 4)

    out = pl.pallas_call(
        functools.partial(magnet_kernel, n=N),
        out_shape=jax.ShapeDtypeStruct((B, N, out_lanes), jnp.float32),
        grid=(B,),
        in_specs=specs,
        out_specs=pl.BlockSpec((1, N, out_lanes), lambda b: (b, 0, 0)),
        compiler_params=pltpu.CompilerParams(dimension_semantics=("parallel",)),
        cost_estimate=pl.CostEstimate(flops=flops, transcendentals=0,
                                      bytes_accessed=bytes_accessed),
    )(*args)

    out = out[:, :, :size_out]                               # drop the zero lane padding
    return out[0] if squeeze else out


# -------------------------- parameter construction ---------------------------

def _uniform(key, shape, fan_in):
    bound = 1.0 / math.sqrt(fan_in) if fan_in > 0 else 0.0
    return jax.random.uniform(key, shape, jnp.float32, -bound, bound)


def init_params(key, size_in, size_out, hidden_dim, K=2):
    assert size_in == size_out, "reference forward only shape-checks when size_in == size_out"
    dims = [hidden_dim, hidden_dim // 2, hidden_dim // 4, hidden_dim // 2, hidden_dim]
    keys = jax.random.split(key, 16)
    p = {}
    # layers[0]: nn.Linear(size_in -> hidden_dim, bias=False); stored as [in, out]
    p["w0"] = _uniform(keys[0], (size_in, hidden_dim), size_in)
    # 4 ChebyshevConv layers, each with weight (K, C_in, C_out) and bias (1, C_out)
    for i in range(4):
        cin, cout = dims[i], dims[i + 1]
        p[f"cw{i + 1}"] = _uniform(keys[1 + 2 * i], (K, cin, cout), cin)
        p[f"cb{i + 1}"] = _uniform(keys[2 + 2 * i], (1, cout), cin)
    # layers[-1]: nn.Linear(hidden_dim -> size_out, bias=False)
    p["w_last"] = _uniform(keys[10], (hidden_dim, size_out), hidden_dim)
    # fresh nn.Linear(2*size_in -> size_out, bias=None) created in forward():
    # deterministic here, split into the real-half / imag-half of its weight.
    w_final = _uniform(keys[11], (2 * size_out, size_out), 2 * size_in)
    p["w_final_r"] = w_final[:size_out]
    p["w_final_i"] = w_final[size_out:]
    return p


# --------------------------- pure-JAX reference -------------------------------

def magnet_reference(x, L_real, L_imag, p):
    """Direct f32 transcription of the PyTorch forward (un-fused, un-folded weights)."""
    def cheb(h, L, w, b):
        return h @ w[0] + (L @ h) @ w[1] + b

    real = x @ p["w0"]
    imag = x @ p["w0"]
    for i in range(1, 5):
        w, b = p[f"cw{i}"], p[f"cb{i}"]
        real = cheb(real, L_real, w, b)
        imag = cheb(imag, L_imag, w, b)
        mask = (real >= 0).astype(jnp.float32)
        real, imag = mask * real, mask * imag
    real = real @ p["w_last"]
    imag = imag @ p["w_last"]
    return real @ p["w_final_r"] + imag @ p["w_final_i"]


# --------------------------------- main ---------------------------------------

if __name__ == "__main__":
    B, N, size_in, size_out, hidden_dim = 4, 64, 16, 16, 32

    key = jax.random.PRNGKey(0)
    k_x, k_lr, k_li, k_p = jax.random.split(key, 4)

    x = jax.random.normal(k_x, (B, N, size_in), jnp.float32)
    L_real = 0.1 * jax.random.normal(k_lr, (B, N, N), jnp.float32)
    L_imag = 0.1 * jax.random.normal(k_li, (B, N, N), jnp.float32)
    params = init_params(k_p, size_in, size_out, hidden_dim, K=2)

    ref = jnp.stack([magnet_reference(x[b], L_real[b], L_imag[b], params) for b in range(B)])

    # f32 checking path: bit-tight vs. the pure-JAX reference.
    out_f32 = jax.block_until_ready(
        magnet_forward(x, L_real, L_imag, params, use_bf16=False))
    assert out_f32.shape == (B, N, size_out), out_f32.shape
    assert jnp.allclose(out_f32, ref, atol=1e-4, rtol=1e-4), \
        float(jnp.max(jnp.abs(out_f32 - ref)))

    # Default perf path: bf16 MXU operands, f32 accumulation -> loose tolerance.
    out = jax.block_until_ready(magnet_forward(x, L_real, L_imag, params))
    assert out.shape == (B, N, size_out), out.shape
    err = float(jnp.max(jnp.abs(out - ref)))
    tol = 5e-2 * max(float(jnp.max(jnp.abs(ref))), 1.0)
    assert err <= tol, (err, tol)

    print("KERNEL_OK")
</pallas_src>

<mosaic_0001>
module attributes {stable_mosaic.version = 11 : i64} {
  func.func @magnet_kernel(%arg0: i32, %arg1: memref<1x64x16xf32, #tpu.memory_space<vmem>>, %arg2: memref<1x64x64xf32, #tpu.memory_space<vmem>>, %arg3: memref<1x64x64xf32, #tpu.memory_space<vmem>>, %arg4: memref<16x32xf32, #tpu.memory_space<vmem>>, %arg5: memref<32x16xf32, #tpu.memory_space<vmem>>, %arg6: memref<32x16xf32, #tpu.memory_space<vmem>>, %arg7: memref<1x16xf32, #tpu.memory_space<vmem>>, %arg8: memref<16x8xf32, #tpu.memory_space<vmem>>, %arg9: memref<16x8xf32, #tpu.memory_space<vmem>>, %arg10: memref<1x8xf32, #tpu.memory_space<vmem>>, %arg11: memref<8x16xf32, #tpu.memory_space<vmem>>, %arg12: memref<8x16xf32, #tpu.memory_space<vmem>>, %arg13: memref<1x16xf32, #tpu.memory_space<vmem>>, %arg14: memref<16x32xf32, #tpu.memory_space<vmem>>, %arg15: memref<16x32xf32, #tpu.memory_space<vmem>>, %arg16: memref<1x32xf32, #tpu.memory_space<vmem>>, %arg17: memref<32x128xf32, #tpu.memory_space<vmem>>, %arg18: memref<32x128xf32, #tpu.memory_space<vmem>>, %arg19: memref<1x64x128xf32, #tpu.memory_space<vmem>>) attributes {dimension_semantics = [#tpu.dimension_semantics<parallel>], iteration_bounds = array<i64: 4>, scalar_prefetch = 0 : i64, scratch_operands = 0 : i64, tpu.core_type = #tpu.core_type<tc>, window_params = [{transform_indices = @transform_0, window_bounds = array<i64: 1, 64, 16>}, {transform_indices = @transform_1, window_bounds = array<i64: 1, 64, 64>}, {transform_indices = @transform_2, window_bounds = array<i64: 1, 64, 64>}, {pipeline_mode = #tpu.pipeline_mode<synchronous>, transform_indices = @transform_3, window_bounds = array<i64: 16, 32>}, {pipeline_mode = #tpu.pipeline_mode<synchronous>, transform_indices = @transform_4, window_bounds = array<i64: 32, 16>}, {pipeline_mode = #tpu.pipeline_mode<synchronous>, transform_indices = @transform_5, window_bounds = array<i64: 32, 16>}, {pipeline_mode = #tpu.pipeline_mode<synchronous>, transform_indices = @transform_6, window_bounds = array<i64: 1, 16>}, {pipeline_mode = #tpu.pipeline_mode<synchronous>, transform_indices = @transform_7, window_bounds = array<i64: 16, 8>}, {pipeline_mode = #tpu.pipeline_mode<synchronous>, transform_indices = @transform_8, window_bounds = array<i64: 16, 8>}, {pipeline_mode = #tpu.pipeline_mode<synchronous>, transform_indices = @transform_9, window_bounds = array<i64: 1, 8>}, {pipeline_mode = #tpu.pipeline_mode<synchronous>, transform_indices = @transform_10, window_bounds = array<i64: 8, 16>}, {pipeline_mode = #tpu.pipeline_mode<synchronous>, transform_indices = @transform_11, window_bounds = array<i64: 8, 16>}, {pipeline_mode = #tpu.pipeline_mode<synchronous>, transform_indices = @transform_12, window_bounds = array<i64: 1, 16>}, {pipeline_mode = #tpu.pipeline_mode<synchronous>, transform_indices = @transform_13, window_bounds = array<i64: 16, 32>}, {pipeline_mode = #tpu.pipeline_mode<synchronous>, transform_indices = @transform_14, window_bounds = array<i64: 16, 32>}, {pipeline_mode = #tpu.pipeline_mode<synchronous>, transform_indices = @transform_15, window_bounds = array<i64: 1, 32>}, {pipeline_mode = #tpu.pipeline_mode<synchronous>, transform_indices = @transform_16, window_bounds = array<i64: 32, 128>}, {pipeline_mode = #tpu.pipeline_mode<synchronous>, transform_indices = @transform_17, window_bounds = array<i64: 32, 128>}, {transform_indices = @transform_18, window_bounds = array<i64: 1, 64, 128>}]} {
    %c0 = arith.constant 0 : index
    %c0_0 = arith.constant 0 : index
    %c0_1 = arith.constant 0 : index
    %0 = vector.load %arg1[%c0, %c0_0, %c0_1] : memref<1x64x16xf32, #tpu.memory_space<vmem>>, vector<1x64x16xf32>
    %1 = vector.shape_cast %0 : vector<1x64x16xf32> to vector<64x16xf32>
    %c0_2 = arith.constant 0 : index
    %c0_3 = arith.constant 0 : index
    %c0_4 = arith.constant 0 : index
    %2 = vector.load %arg2[%c0_2, %c0_3, %c0_4] : memref<1x64x64xf32, #tpu.memory_space<vmem>>, vector<1x64x64xf32>
    %3 = vector.shape_cast %2 : vector<1x64x64xf32> to vector<64x64xf32>
    %c0_5 = arith.constant 0 : index
    %c0_6 = arith.constant 0 : index
    %c0_7 = arith.constant 0 : index
    %4 = vector.load %arg3[%c0_5, %c0_6, %c0_7] : memref<1x64x64xf32, #tpu.memory_space<vmem>>, vector<1x64x64xf32>
    %5 = vector.shape_cast %4 : vector<1x64x64xf32> to vector<64x64xf32>
    %c0_8 = arith.constant 0 : index
    %c0_9 = arith.constant 0 : index
    %6 = vector.load %arg4[%c0_8, %c0_9] : memref<16x32xf32, #tpu.memory_space<vmem>>, vector<16x32xf32>
    %cst = arith.constant dense<0.000000e+00> : vector<64x32xf32>
    %7 = tpu.matmul %1, %6, %cst {dimension_numbers = #tpu.dot_dimension_numbers<[1], [0], [0], [1], [0, 0, 1, 1], [], []>} : vector<64x16xf32>, vector<16x32xf32>, vector<64x32xf32> -> vector<64x32xf32>
    %8 = tpu.concatenate %7, %7 in 0 : vector<64x32xf32>, vector<64x32xf32> -> vector<128x32xf32>
    %cst_10 = arith.constant dense<0.000000e+00> : vector<64x32xf32>
    %9 = tpu.matmul %3, %7, %cst_10 {dimension_numbers = #tpu.dot_dimension_numbers<[1], [0], [0], [1], [0, 0, 1, 1], [], []>} : vector<64x64xf32>, vector<64x32xf32>, vector<64x32xf32> -> vector<64x32xf32>
    %cst_11 = arith.constant dense<0.000000e+00> : vector<64x32xf32>
    %10 = tpu.matmul %5, %7, %cst_11 {dimension_numbers = #tpu.dot_dimension_numbers<[1], [0], [0], [1], [0, 0, 1, 1], [], []>} : vector<64x64xf32>, vector<64x32xf32>, vector<64x32xf32> -> vector<64x32xf32>
    %11 = tpu.concatenate %9, %10 in 0 : vector<64x32xf32>, vector<64x32xf32> -> vector<128x32xf32>
    %c0_12 = arith.constant 0 : index
    %c0_13 = arith.constant 0 : index
    %12 = vector.load %arg5[%c0_12, %c0_13] : memref<32x16xf32, #tpu.memory_space<vmem>>, vector<32x16xf32>
    %cst_14 = arith.constant dense<0.000000e+00> : vector<128x16xf32>
    %13 = tpu.matmul %8, %12, %cst_14 {dimension_numbers = #tpu.dot_dimension_numbers<[1], [0], [0], [1], [0, 0, 1, 1], [], []>} : vector<128x32xf32>, vector<32x16xf32>, vector<128x16xf32> -> vector<128x16xf32>
    %c0_15 = arith.constant 0 : index
    %c0_16 = arith.constant 0 : index
    %14 = vector.load %arg6[%c0_15, %c0_16] : memref<32x16xf32, #tpu.memory_space<vmem>>, vector<32x16xf32>
    %cst_17 = arith.constant dense<0.000000e+00> : vector<128x16xf32>
    %15 = tpu.matmul %11, %14, %cst_17 {dimension_numbers = #tpu.dot_dimension_numbers<[1], [0], [0], [1], [0, 0, 1, 1], [], []>} : vector<128x32xf32>, vector<32x16xf32>, vector<128x16xf32> -> vector<128x16xf32>
    %16 = arith.addf %13, %15 : vector<128x16xf32>
    %c0_18 = arith.constant 0 : index
    %c0_19 = arith.constant 0 : index
    %17 = vector.load %arg7[%c0_18, %c0_19] : memref<1x16xf32, #tpu.memory_space<vmem>>, vector<1x16xf32>
    %18 = vector.broadcast %17 : vector<1x16xf32> to vector<128x16xf32>
    %19 = arith.addf %16, %18 : vector<128x16xf32>
    %20 = vector.extract_strided_slice %19 {offsets = [0, 0], sizes = [64, 16], strides = [1, 1]} : vector<128x16xf32> to vector<64x16xf32>
    %cst_20 = arith.constant 0.000000e+00 : f32
    %21 = vector.broadcast %cst_20 : f32 to vector<64x16xf32>
    %22 = arith.cmpf oge, %20, %21 : vector<64x16xf32>
    %23 = vector.extract_strided_slice %19 {offsets = [0, 0], sizes = [64, 16], strides = [1, 1]} : vector<128x16xf32> to vector<64x16xf32>
    %cst_21 = arith.constant 0.000000e+00 : f32
    %24 = vector.broadcast %cst_21 : f32 to vector<64x16xf32>
    %25 = arith.select %22, %23, %24 : vector<64x16xi1>, vector<64x16xf32>
    %26 = vector.extract_strided_slice %19 {offsets = [64, 0], sizes = [64, 16], strides = [1, 1]} : vector<128x16xf32> to vector<64x16xf32>
    %cst_22 = arith.constant 0.000000e+00 : f32
    %27 = vector.broadcast %cst_22 : f32 to vector<64x16xf32>
    %28 = arith.select %22, %26, %27 : vector<64x16xi1>, vector<64x16xf32>
    %29 = tpu.concatenate %25, %28 in 0 : vector<64x16xf32>, vector<64x16xf32> -> vector<128x16xf32>
    %cst_23 = arith.constant dense<0.000000e+00> : vector<64x16xf32>
    %30 = tpu.matmul %3, %25, %cst_23 {dimension_numbers = #tpu.dot_dimension_numbers<[1], [0], [0], [1], [0, 0, 1, 1], [], []>} : vector<64x64xf32>, vector<64x16xf32>, vector<64x16xf32> -> vector<64x16xf32>
    %cst_24 = arith.constant dense<0.000000e+00> : vector<64x16xf32>
    %31 = tpu.matmul %5, %28, %cst_24 {dimension_numbers = #tpu.dot_dimension_numbers<[1], [0], [0], [1], [0, 0, 1, 1], [], []>} : vector<64x64xf32>, vector<64x16xf32>, vector<64x16xf32> -> vector<64x16xf32>
    %32 = tpu.concatenate %30, %31 in 0 : vector<64x16xf32>, vector<64x16xf32> -> vector<128x16xf32>
    %c0_25 = arith.constant 0 : index
    %c0_26 = arith.constant 0 : index
    %33 = vector.load %arg8[%c0_25, %c0_26] : memref<16x8xf32, #tpu.memory_space<vmem>>, vector<16x8xf32>
    %cst_27 = arith.constant dense<0.000000e+00> : vector<128x8xf32>
    %34 = tpu.matmul %29, %33, %cst_27 {dimension_numbers = #tpu.dot_dimension_numbers<[1], [0], [0], [1], [0, 0, 1, 1], [], []>} : vector<128x16xf32>, vector<16x8xf32>, vector<128x8xf32> -> vector<128x8xf32>
    %c0_28 = arith.constant 0 : index
    %c0_29 = arith.constant 0 : index
    %35 = vector.load %arg9[%c0_28, %c0_29] : memref<16x8xf32, #tpu.memory_space<vmem>>, vector<16x8xf32>
    %cst_30 = arith.constant dense<0.000000e+00> : vector<128x8xf32>
    %36 = tpu.matmul %32, %35, %cst_30 {dimension_numbers = #tpu.dot_dimension_numbers<[1], [0], [0], [1], [0, 0, 1, 1], [], []>} : vector<128x16xf32>, vector<16x8xf32>, vector<128x8xf32> -> vector<128x8xf32>
    %37 = arith.addf %34, %36 : vector<128x8xf32>
    %c0_31 = arith.constant 0 : index
    %c0_32 = arith.constant 0 : index
    %38 = vector.load %arg10[%c0_31, %c0_32] : memref<1x8xf32, #tpu.memory_space<vmem>>, vector<1x8xf32>
    %39 = vector.broadcast %38 : vector<1x8xf32> to vector<128x8xf32>
    %40 = arith.addf %37, %39 : vector<128x8xf32>
    %41 = vector.extract_strided_slice %40 {offsets = [0, 0], sizes = [64, 8], strides = [1, 1]} : vector<128x8xf32> to vector<64x8xf32>
    %cst_33 = arith.constant 0.000000e+00 : f32
    %42 = vector.broadcast %cst_33 : f32 to vector<64x8xf32>
    %43 = arith.cmpf oge, %41, %42 : vector<64x8xf32>
    %44 = vector.extract_strided_slice %40 {offsets = [0, 0], sizes = [64, 8], strides = [1, 1]} : vector<128x8xf32> to vector<64x8xf32>
    %cst_34 = arith.constant 0.000000e+00 : f32
    %45 = vector.broadcast %cst_34 : f32 to vector<64x8xf32>
    %46 = arith.select %43, %44, %45 : vector<64x8xi1>, vector<64x8xf32>
    %47 = vector.extract_strided_slice %40 {offsets = [64, 0], sizes = [64, 8], strides = [1, 1]} : vector<128x8xf32> to vector<64x8xf32>
    %cst_35 = arith.constant 0.000000e+00 : f32
    %48 = vector.broadcast %cst_35 : f32 to vector<64x8xf32>
    %49 = arith.select %43, %47, %48 : vector<64x8xi1>, vector<64x8xf32>
    %50 = tpu.concatenate %46, %49 in 0 : vector<64x8xf32>, vector<64x8xf32> -> vector<128x8xf32>
    %cst_36 = arith.constant dense<0.000000e+00> : vector<64x8xf32>
    %51 = tpu.matmul %3, %46, %cst_36 {dimension_numbers = #tpu.dot_dimension_numbers<[1], [0], [0], [1], [0, 0, 1, 1], [], []>} : vector<64x64xf32>, vector<64x8xf32>, vector<64x8xf32> -> vector<64x8xf32>
    %cst_37 = arith.constant dense<0.000000e+00> : vector<64x8xf32>
    %52 = tpu.matmul %5, %49, %cst_37 {dimension_numbers = #tpu.dot_dimension_numbers<[1], [0], [0], [1], [0, 0, 1, 1], [], []>} : vector<64x64xf32>, vector<64x8xf32>, vector<64x8xf32> -> vector<64x8xf32>
    %53 = tpu.concatenate %51, %52 in 0 : vector<64x8xf32>, vector<64x8xf32> -> vector<128x8xf32>
    %c0_38 = arith.constant 0 : index
    %c0_39 = arith.constant 0 : index
    %54 = vector.load %arg11[%c0_38, %c0_39] : memref<8x16xf32, #tpu.memory_space<vmem>>, vector<8x16xf32>
    %cst_40 = arith.constant dense<0.000000e+00> : vector<128x16xf32>
    %55 = tpu.matmul %50, %54, %cst_40 {dimension_numbers = #tpu.dot_dimension_numbers<[1], [0], [0], [1], [0, 0, 1, 1], [], []>} : vector<128x8xf32>, vector<8x16xf32>, vector<128x16xf32> -> vector<128x16xf32>
    %c0_41 = arith.constant 0 : index
    %c0_42 = arith.constant 0 : index
    %56 = vector.load %arg12[%c0_41, %c0_42] : memref<8x16xf32, #tpu.memory_space<vmem>>, vector<8x16xf32>
    %cst_43 = arith.constant dense<0.000000e+00> : vector<128x16xf32>
    %57 = tpu.matmul %53, %56, %cst_43 {dimension_numbers = #tpu.dot_dimension_numbers<[1], [0], [0], [1], [0, 0, 1, 1], [], []>} : vector<128x8xf32>, vector<8x16xf32>, vector<128x16xf32> -> vector<128x16xf32>
    %58 = arith.addf %55, %57 : vector<128x16xf32>
    %c0_44 = arith.constant 0 : index
    %c0_45 = arith.constant 0 : index
    %59 = vector.load %arg13[%c0_44, %c0_45] : memref<1x16xf32, #tpu.memory_space<vmem>>, vector<1x16xf32>
    %60 = vector.broadcast %59 : vector<1x16xf32> to vector<128x16xf32>
    %61 = arith.addf %58, %60 : vector<128x16xf32>
    %62 = vector.extract_strided_slice %61 {offsets = [0, 0], sizes = [64, 16], strides = [1, 1]} : vector<128x16xf32> to vector<64x16xf32>
    %cst_46 = arith.constant 0.000000e+00 : f32
    %63 = vector.broadcast %cst_46 : f32 to vector<64x16xf32>
    %64 = arith.cmpf oge, %62, %63 : vector<64x16xf32>
    %65 = vector.extract_strided_slice %61 {offsets = [0, 0], sizes = [64, 16], strides = [1, 1]} : vector<128x16xf32> to vector<64x16xf32>
    %cst_47 = arith.constant 0.000000e+00 : f32
    %66 = vector.broadcast %cst_47 : f32 to vector<64x16xf32>
    %67 = arith.select %64, %65, %66 : vector<64x16xi1>, vector<64x16xf32>
    %68 = vector.extract_strided_slice %61 {offsets = [64, 0], sizes = [64, 16], strides = [1, 1]} : vector<128x16xf32> to vector<64x16xf32>
    %cst_48 = arith.constant 0.000000e+00 : f32
    %69 = vector.broadcast %cst_48 : f32 to vector<64x16xf32>
    %70 = arith.select %64, %68, %69 : vector<64x16xi1>, vector<64x16xf32>
    %71 = tpu.concatenate %67, %70 in 0 : vector<64x16xf32>, vector<64x16xf32> -> vector<128x16xf32>
    %cst_49 = arith.constant dense<0.000000e+00> : vector<64x16xf32>
    %72 = tpu.matmul %3, %67, %cst_49 {dimension_numbers = #tpu.dot_dimension_numbers<[1], [0], [0], [1], [0, 0, 1, 1], [], []>} : vector<64x64xf32>, vector<64x16xf32>, vector<64x16xf32> -> vector<64x16xf32>
    %cst_50 = arith.constant dense<0.000000e+00> : vector<64x16xf32>
    %73 = tpu.matmul %5, %70, %cst_50 {dimension_numbers = #tpu.dot_dimension_numbers<[1], [0], [0], [1], [0, 0, 1, 1], [], []>} : vector<64x64xf32>, vector<64x16xf32>, vector<64x16xf32> -> vector<64x16xf32>
    %74 = tpu.concatenate %72, %73 in 0 : vector<64x16xf32>, vector<64x16xf32> -> vector<128x16xf32>
    %c0_51 = arith.constant 0 : index
    %c0_52 = arith.constant 0 : index
    %75 = vector.load %arg14[%c0_51, %c0_52] : memref<16x32xf32, #tpu.memory_space<vmem>>, vector<16x32xf32>
    %cst_53 = arith.constant dense<0.000000e+00> : vector<128x32xf32>
    %76 = tpu.matmul %71, %75, %cst_53 {dimension_numbers = #tpu.dot_dimension_numbers<[1], [0], [0], [1], [0, 0, 1, 1], [], []>} : vector<128x16xf32>, vector<16x32xf32>, vector<128x32xf32> -> vector<128x32xf32>
    %c0_54 = arith.constant 0 : index
    %c0_55 = arith.constant 0 : index
    %77 = vector.load %arg15[%c0_54, %c0_55] : memref<16x32xf32, #tpu.memory_space<vmem>>, vector<16x32xf32>
    %cst_56 = arith.constant dense<0.000000e+00> : vector<128x32xf32>
    %78 = tpu.matmul %74, %77, %cst_56 {dimension_numbers = #tpu.dot_dimension_numbers<[1], [0], [0], [1], [0, 0, 1, 1], [], []>} : vector<128x16xf32>, vector<16x32xf32>, vector<128x32xf32> -> vector<128x32xf32>
    %79 = arith.addf %76, %78 : vector<128x32xf32>
    %c0_57 = arith.constant 0 : index
    %c0_58 = arith.constant 0 : index
    %80 = vector.load %arg16[%c0_57, %c0_58] : memref<1x32xf32, #tpu.memory_space<vmem>>, vector<1x32xf32>
    %81 = vector.broadcast %80 : vector<1x32xf32> to vector<128x32xf32>
    %82 = arith.addf %79, %81 : vector<128x32xf32>
    %83 = vector.extract_strided_slice %82 {offsets = [0, 0], sizes = [64, 32], strides = [1, 1]} : vector<128x32xf32> to vector<64x32xf32>
    %cst_59 = arith.constant 0.000000e+00 : f32
    %84 = vector.broadcast %cst_59 : f32 to vector<64x32xf32>
    %85 = arith.cmpf oge, %83, %84 : vector<64x32xf32>
    %86 = vector.extract_strided_slice %82 {offsets = [0, 0], sizes = [64, 32], strides = [1, 1]} : vector<128x32xf32> to vector<64x32xf32>
    %cst_60 = arith.constant 0.000000e+00 : f32
    %87 = vector.broadcast %cst_60 : f32 to vector<64x32xf32>
    %88 = arith.select %85, %86, %87 : vector<64x32xi1>, vector<64x32xf32>
    %89 = vector.extract_strided_slice %82 {offsets = [64, 0], sizes = [64, 32], strides = [1, 1]} : vector<128x32xf32> to vector<64x32xf32>
    %cst_61 = arith.constant 0.000000e+00 : f32
    %90 = vector.broadcast %cst_61 : f32 to vector<64x32xf32>
    %91 = arith.select %85, %89, %90 : vector<64x32xi1>, vector<64x32xf32>
    %c0_62 = arith.constant 0 : index
    %c0_63 = arith.constant 0 : index
    %92 = vector.load %arg17[%c0_62, %c0_63] : memref<32x128xf32, #tpu.memory_space<vmem>>, vector<32x128xf32>
    %cst_64 = arith.constant dense<0.000000e+00> : vector<64x128xf32>
    %93 = tpu.matmul %88, %92, %cst_64 {dimension_numbers = #tpu.dot_dimension_numbers<[1], [0], [0], [1], [0, 0, 1, 1], [], []>} : vector<64x32xf32>, vector<32x128xf32>, vector<64x128xf32> -> vector<64x128xf32>
    %c0_65 = arith.constant 0 : index
    %c0_66 = arith.constant 0 : index
    %94 = vector.load %arg18[%c0_65, %c0_66] : memref<32x128xf32, #tpu.memory_space<vmem>>, vector<32x128xf32>
    %cst_67 = arith.constant dense<0.000000e+00> : vector<64x128xf32>
    %95 = tpu.matmul %91, %94, %cst_67 {dimension_numbers = #tpu.dot_dimension_numbers<[1], [0], [0], [1], [0, 0, 1, 1], [], []>} : vector<64x32xf32>, vector<32x128xf32>, vector<64x128xf32> -> vector<64x128xf32>
    %96 = arith.addf %93, %95 : vector<64x128xf32>
    %c0_68 = arith.constant 0 : index
    %c0_69 = arith.constant 0 : index
    %c0_70 = arith.constant 0 : index
    %97 = vector.load %arg19[%c0_68, %c0_69, %c0_70] : memref<1x64x128xf32, #tpu.memory_space<vmem>>, vector<1x64x128xf32>
    %98 = vector.shape_cast %97 : vector<1x64x128xf32> to vector<64x128xf32>
    %99 = vector.shape_cast %96 : vector<64x128xf32> to vector<1x64x128xf32>
    tpu.vector_store %arg19[%c0_68, %c0_69, %c0_70], %99 {strides = array<i32>} : memref<1x64x128xf32, #tpu.memory_space<vmem>>, vector<1x64x128xf32>,
    return
  }
  func.func @transform_0(%arg0: i32) -> (i32, i32, i32) {
    %c0_i32 = arith.constant 0 : i32
    %c0_i32_0 = arith.constant 0 : i32
    %c0_i32_1 = arith.constant 0 : i32
    return %arg0, %c0_i32, %c0_i32_0 : i32, i32, i32
  }
  func.func @transform_1(%arg0: i32) -> (i32, i32, i32) {
    %c0_i32 = arith.constant 0 : i32
    %c0_i32_0 = arith.constant 0 : i32
    %c0_i32_1 = arith.constant 0 : i32
    return %arg0, %c0_i32, %c0_i32_0 : i32, i32, i32
  }
  func.func @transform_2(%arg0: i32) -> (i32, i32, i32) {
    %c0_i32 = arith.constant 0 : i32
    %c0_i32_0 = arith.constant 0 : i32
    %c0_i32_1 = arith.constant 0 : i32
    return %arg0, %c0_i32, %c0_i32_0 : i32, i32, i32
  }
  func.func @transform_3(%arg0: i32) -> (i32, i32) {
    %c0_i32 = arith.constant 0 : i32
    %c0_i32_0 = arith.constant 0 : i32
    %c0_i32_1 = arith.constant 0 : i32
    return %c0_i32, %c0_i32_0 : i32, i32
  }
  func.func @transform_4(%arg0: i32) -> (i32, i32) {
    %c0_i32 = arith.constant 0 : i32
    %c0_i32_0 = arith.constant 0 : i32
    %c0_i32_1 = arith.constant 0 : i32
    return %c0_i32, %c0_i32_0 : i32, i32
  }
  func.func @transform_5(%arg0: i32) -> (i32, i32) {
    %c0_i32 = arith.constant 0 : i32
    %c0_i32_0 = arith.constant 0 : i32
    %c0_i32_1 = arith.constant 0 : i32
    return %c0_i32, %c0_i32_0 : i32, i32
  }
  func.func @transform_6(%arg0: i32) -> (i32, i32) {
    %c0_i32 = arith.constant 0 : i32
    %c0_i32_0 = arith.constant 0 : i32
    %c0_i32_1 = arith.constant 0 : i32
    return %c0_i32, %c0_i32_0 : i32, i32
  }
  func.func @transform_7(%arg0: i32) -> (i32, i32) {
    %c0_i32 = arith.constant 0 : i32
    %c0_i32_0 = arith.constant 0 : i32
    %c0_i32_1 = arith.constant 0 : i32
    return %c0_i32, %c0_i32_0 : i32, i32
  }
  func.func @transform_8(%arg0: i32) -> (i32, i32) {
    %c0_i32 = arith.constant 0 : i32
    %c0_i32_0 = arith.constant 0 : i32
    %c0_i32_1 = arith.constant 0 : i32
    return %c0_i32, %c0_i32_0 : i32, i32
  }
  func.func @transform_9(%arg0: i32) -> (i32, i32) {
    %c0_i32 = arith.constant 0 : i32
    %c0_i32_0 = arith.constant 0 : i32
    %c0_i32_1 = arith.constant 0 : i32
    return %c0_i32, %c0_i32_0 : i32, i32
  }
  func.func @transform_10(%arg0: i32) -> (i32, i32) {
    %c0_i32 = arith.constant 0 : i32
    %c0_i32_0 = arith.constant 0 : i32
    %c0_i32_1 = arith.constant 0 : i32
    return %c0_i32, %c0_i32_0 : i32, i32
  }
  func.func @transform_11(%arg0: i32) -> (i32, i32) {
    %c0_i32 = arith.constant 0 : i32
    %c0_i32_0 = arith.constant 0 : i32
    %c0_i32_1 = arith.constant 0 : i32
    return %c0_i32, %c0_i32_0 : i32, i32
  }
  func.func @transform_12(%arg0: i32) -> (i32, i32) {
    %c0_i32 = arith.constant 0 : i32
    %c0_i32_0 = arith.constant 0 : i32
    %c0_i32_1 = arith.constant 0 : i32
    return %c0_i32, %c0_i32_0 : i32, i32
  }
  func.func @transform_13(%arg0: i32) -> (i32, i32) {
    %c0_i32 = arith.constant 0 : i32
    %c0_i32_0 = arith.constant 0 : i32
    %c0_i32_1 = arith.constant 0 : i32
    return %c0_i32, %c0_i32_0 : i32, i32
  }
  func.func @transform_14(%arg0: i32) -> (i32, i32) {
    %c0_i32 = arith.constant 0 : i32
    %c0_i32_0 = arith.constant 0 : i32
    %c0_i32_1 = arith.constant 0 : i32
    return %c0_i32, %c0_i32_0 : i32, i32
  }
  func.func @transform_15(%arg0: i32) -> (i32, i32) {
    %c0_i32 = arith.constant 0 : i32
    %c0_i32_0 = arith.constant 0 : i32
    %c0_i32_1 = arith.constant 0 : i32
    return %c0_i32, %c0_i32_0 : i32, i32
  }
  func.func @transform_16(%arg0: i32) -> (i32, i32) {
    %c0_i32 = arith.constant 0 : i32
    %c0_i32_0 = arith.constant 0 : i32
    %c0_i32_1 = arith.constant 0 : i32
    return %c0_i32, %c0_i32_0 : i32, i32
  }
  func.func @transform_17(%arg0: i32) -> (i32, i32) {
    %c0_i32 = arith.constant 0 : i32
    %c0_i32_0 = arith.constant 0 : i32
    %c0_i32_1 = arith.constant 0 : i32
    return %c0_i32, %c0_i32_0 : i32, i32
  }
  func.func @transform_18(%arg0: i32) -> (i32, i32, i32) {
    %c0_i32 = arith.constant 0 : i32
    %c0_i32_0 = arith.constant 0 : i32
    %c0_i32_1 = arith.constant 0 : i32
    return %arg0, %c0_i32, %c0_i32_0 : i32, i32, i32
  }
}

</mosaic_0001>

<bundles_post_ra>
// kernel: tpu_custom_call.1
= control target key start
LH: loop header
LB: loop body
LE: loop exit
PB: predicated region body
PF: predicated region fallthrough
CT: control target
= control target key end

     0   :  { %s4052_s0 = inlined_call_operand.vmem [shape: f32[4,64,16], index: 0, kind: input, shape index: {}]   ;;  %s4053_s1 = inlined_call_operand.vmem [shape: f32[4,64,64], index: 1, kind: input, shape index: {}]   ;;  %s4054_s2 = inlined_call_operand.hbm [shape: f32[4,64,64], index: 2, kind: input, shape index: {}]   ;;  %s4055_s3 = inlined_call_operand.vmem [shape: f32[16,32], index: 3, kind: input, shape index: {}]   ;;  %s4056_s4 = inlined_call_operand.vmem [shape: f32[32,16], index: 4, kind: input, shape index: {}]   ;;  %s4057_s5 = inlined_call_operand.vmem [shape: f32[32,16], index: 5, kind: input, shape index: {}]   ;;  %s4058_s6 = inlined_call_operand.vmem [shape: f32[1,16], index: 6, kind: input, shape index: {}]   ;;  %s4059_s7 = inlined_call_operand.vmem [shape: f32[16,8], index: 7, kind: input, shape index: {}]   ;;  %s4060_s8 = inlined_call_operand.vmem [shape: f32[16,8], index: 8, kind: input, shape index: {}]   ;;  %s4061_s9 = inlined_call_operand.vmem [shape: f32[1,8], index: 9, kind: input, shape index: {}]   ;;  %s4062_s10 = inlined_call_operand.vmem [shape: f32[8,16], index: 10, kind: input, shape index: {}]   ;;  %s4063_s11 = inlined_call_operand.vmem [shape: f32[8,16], index: 11, kind: input, shape index: {}]   ;;  %s4064_s12 = inlined_call_operand.vmem [shape: f32[1,16], index: 12, kind: input, shape index: {}]   ;;  %s4065_s13 = inlined_call_operand.vmem [shape: f32[16,32], index: 13, kind: input, shape index: {}]   ;;  %s4066_s14 = inlined_call_operand.vmem [shape: f32[16,32], index: 14, kind: input, shape index: {}]   ;;  %s4067_s15 = inlined_call_operand.vmem [shape: f32[1,32], index: 15, kind: input, shape index: {}]   ;;  %s4068_s16 = inlined_call_operand.vmem [shape: f32[32,128], index: 16, kind: input, shape index: {}]   ;;  %s4069_s17 = inlined_call_operand.vmem [shape: f32[32,128], index: 17, kind: input, shape index: {}]   ;;  %s4070_s18 = inlined_call_operand.hbm [shape: f32[4,64,128], index: 18, kind: output, shape index: {}]  }
   0x1   :  { %4084 = sst [smem:[#allocation14_spill]] %s4052_s0 }
   0x2   :  { %4085 = sst [smem:[#allocation15_spill]] %s4053_s1 }
   0x3   :  { %4086 = sst [smem:[#allocation16_spill]] %s4054_s2 }
   0x4   :  { %4087 = sst [smem:[#allocation17_spill]] %s4055_s3 }
   0x5   :  { %4088 = sst [smem:[#allocation18_spill]] %s4066_s14 }
   0x6   :  { %4089 = sst [smem:[#allocation19_spill]] %s4067_s15 }
   0x7   :  { %4090 = sst [smem:[#allocation20_spill]] %s4068_s16 }
   0x8   :  { %4091 = sst [smem:[#allocation21_spill]] %s4069_s17 }
   0x9   :  { %4092 = sst [smem:[#allocation22_spill]] %s4070_s18 }
   0xa   :  { %23 = vsyncpa [#allocation3], 0 }
   0xb   :  { %25 = vsyncpa [#allocation3 + $0x1], 0 }
   0xc   :  { %26 = vsyncpa [#allocation4], 0 }
   0xd   :  { %28 = vsyncpa [#allocation4 + $0x1], 0  ;;  %s2991_s27 = smov 0   ;;  %s2993_s28 = smov 0  }
   0xe   :  { %s2995_s29 = smov 0   ;;  %s2997_s30 = smov 0  }
   0xf LB: > { %4093 = sst [smem:[#allocation8_spill]] %s2878_s27  ;;  %s3012_s0 = sadd.s32 4294967295, %s2890_s30   ;;  %s2890_s30 = sphi %s2997_s30, %s4119_s30   ;;  %s2886_s29 = sphi %s2995_s29, %s4121_s29   ;;  %s2882_s28 = sphi %s2993_s28, %s4123_s28   ;;  %s2878_s27 = sphi %s2991_s27, %s4122_s27  }
  0x10   : > { %4094 = sst [smem:[#allocation9_spill]] %s2886_s29  ;;  %s2440_s19 = sadd.s32 4294967294, %s2890_s30  }
  0x11   : > { %s3016_s1 = sadd.s32 1, %s2890_s30   ;;  %s93_s20 = sadd.s32 1, %s2886_s29 }
  0x12   : > { %4095 = sst [smem:[#allocation10_spill]] %s3016_s1  ;;  %s90_s21 = ssub.s32 %s2890_s30, %s3016_s1 }
  0x13   : > { %p100_p0 = scmp.ne.s32.totalorder %s2886_s29, %s2882_s28  ;;  %p91_p1 = scmp.eq.s32.totalorder %s90_s21, 0 }
  0x14   : > { %p101_p2 = scmp.eq.s32.totalorder %s2890_s30, 0  ;;  %p106_p3 = scmp.ne.s32.totalorder %s2882_s28, %s2878_s27 }
  0x15   : > { %p107_p4 = scmp.eq.s32.totalorder %s3012_s0, 0  ;;  %p445_p7 = scmp.eq.s32.totalorder %s3012_s0, 3 }
  0x16   : > { %s3028_s22 = scalar_select %p91_p1, %s2886_s29, %s93_s20  }
  0x17   : > { %p3030_p5 = por %p101_p2, %p100_p0  ;;  %p3034_p6 = por %p107_p4, %p106_p3 }
  0x18   : > { %4096 = sst [smem:[#allocation11_spill]] %s3028_s22  ;;  %p451_p8 = scmp.eq.s32.totalorder %s2440_s19, 3 }
  0x19   : > { %p2752_p9 = scmp.lt.s32.totalorder %s2890_s30, 4  ;;  %p3040_p10 = por %p445_p7, %p100_p0 }
  0x1a   : > { %p3044_p11 = por %p451_p8, %p106_p3  ;;  %s532_s26 = sand.u32 1, %s2886_s29  }
  0x1b   : > { %s4099_s24 = scalar_select %p3040_p10, 1, 0 }
  0x1c   : > { %s4101_s25 = scalar_select %p3044_p11, 1, 0 }
  0x1d   : > { %4100 = sst [smem:[#allocation12_spill]] %s4099_s24  ;;  %s2722_s20 = sshll.u32 %s2890_s30, 6 }
  0x1e   : > { %4102 = sst [smem:[#allocation13_spill]] %s4101_s25  ;;  %s2443_s21 = sshll.u32 %s532_s26, 6 }
  0x1f   : > { %s4103_s27 = sld [smem:[#allocation16_spill]]  ;;  %s536_s16 = scalar_lea.vmem [#allocation2], %s2443_s21 }
  0x20   : > { %s544_s14 = sshll.u32 %s536_s16, 4  ;;  %p3055_p12 = pnand %p2752_p9, %p3030_p5  ;;  %s545_s14 = int_to_ptr.vmem [resolvable:$true] %s544_s14 }
  0x21   : > { %p2446_p13 = scmp.ge.s32.totalorder %s2890_s30, 1  ;;  %p552_p0 = scmp.lt.s32.totalorder %s2890_s30, 5 }
  0x22   : > { %s533_s29 = scalar_lea.sflag [#allocation3], %s532_s26  ;;  %p2798_p2 = pneg %p3055_p12 }
  0x25   : > { %s4104_s18 = smov %s4103_s27  ;;  %s541_s17 = scalar_lea.hbm %s4103_s27, %s2722_s20 }
  0x26   : > { %s542_s15 = sshll.u32 %s541_s17, 4  ;;  %s2801_s27 = scalar_lea.hbm %s4104_s18, 256  ;;  %s543_s15 = int_to_ptr.hbm [resolvable:$true] %s542_s15 }
  0x27   : > { %s2794_s25 = sshra.s32 %s543_s15, 4  ;;  %s2795_s25 = int_to_ptr.hbm [resolvable:$true] %s2794_s25 }
  0x28   : > { %s2796_s24 = scalar_lea.hbm %s2795_s25, 64  ;;  %p2802_p5 = scmp.lt.s32.totalorder %s2795_s25, %s4104_s18 }
  0x29   : > { %p2797_p1 = scmp.ne.s32.totalorder %s2795_s25, %s2796_s24  ;;  %p2803_p7 = scmp.lt.s32.totalorder %s2801_s27, %s2796_s24 }
  0x2b   : > { %p2799_p3 = pnand %p2798_p2, %p2797_p1  ;;  %p2804_p8 = por %p2803_p7, %p2802_p5 }
  0x2d   : > { %p2800_p4 = pneg %p2799_p3 }
  0x2f   : > { %p2805_p9 = pnand %p2804_p8, %p2800_p4 }
  0x31   : > { %2808 = shalt.err (!%p2805_p9)
}
  0x32   : > { %s2892_s2 = smov 128   ;;  %s2893_s26 = smov 8  }
  0x33   : > { %2747 = dma.hbm_to_vmem [thread:$0]  (!%p3055_p12), %s543_s15, 1024, %s545_s14, %s533_s29, %s2892_s2, %s2892_s2, %s2893_s26  }
  0x34   : > { %p553_p1 = pnand %p2446_p13, %p552_p0 }
  0x35   : > { %s3076_s20 = sand.u32 (!%p553_p1), 1, %s2882_s28  }
  0x36   : > { %556 = sbr.rel (%p553_p1) target bundleno = 1805 (0x70d), region = 92  ;;  %s2447_s24 = sshll.u32 (!%p553_p1), %s3076_s20, 6 }
  0x37   : > { %s559_s25 = scalar_lea.sflag (!%p553_p1), [#allocation3], %s3076_s20  ;;  %s3082_s21 = scalar_lea.vmem (!%p553_p1), [#allocation2], %s2447_s24 }
  0x3b   : > { %2869 = dma.done.wait (%p3034_p6), %s559_s25, 1024  }
  0x3c   : > { %2871 = vsyncadd (%p3034_p6), %s559_s25, 4294966272  ;;  %p626_p12 = scmp.lt.s32.totalorder %s3012_s0, 3  ;;  %s4106_s16 = sld [smem:[#allocation14_spill]]  ;;  %vm662_vm0 = vcmask 130048   ;;  %v862_v6 = vld [vmem:[%s4056_s4 + $0x18] sm:$0xff]  ;;  %v861_v7 = vld [vmem:[%s4056_s4 + $0x10] sm:$0xff] }
  0x3d   : > { %s4107_s3 = sld [smem:[#allocation17_spill]]  ;;  %v860_v8 = vld [vmem:[%s4056_s4 + $0x8] sm:$0xff]  ;;  %v859_v13 = vld [vmem:[%s4056_s4] sm:$0xff]  ;;  %vm867_vm1 = vcmask 261120   ;;  %vm728_vm2 = vcmask 523264   ;;  %v3198_v32 = vld [vmem:[%s3082_s21 + $0x10] sm:$0xff] }
  0x3e   : > { %s3090_s14 = scalar_select %p626_p12, %s3012_s0, 3  ;;  %v3187_v30 = vld [vmem:[%s3082_s21] sm:$0xff]  ;;  %v3193_v31 = vld [vmem:[%s3082_s21 + $0x8] sm:$0xff]  ;;  %v3203_v33 = vld [vmem:[%s3082_s21 + $0x18] sm:$0xff] }
  0x3f   : > { %s4108_s23 = sld [smem:[#allocation15_spill]]  ;;  %v3208_v34 = vld [vmem:[%s3082_s21 + $0x20] sm:$0xff]  ;;  %v3213_v35 = vld [vmem:[%s3082_s21 + $0x28] sm:$0xff]  ;;  %v866_v36 = vld [vmem:[%s4057_s5 + $0x18] sm:$0xff]  ;;  %s4009_s25 = scalar_lea.vmem [#allocation5], %s2447_s24 }
  0x40   : > { %s2723_s15 = sshll.u32 %s3090_s14, 6  ;;  %v865_v37 = vld [vmem:[%s4057_s5 + $0x10] sm:$0xff]  ;;  %928 = vmatpush.msra.mxu3 %v866_v36  ;;  %v864_v38 = vld [vmem:[%s4057_s5 + $0x8] sm:$0xff]  ;;  %v863_v39 = vld [vmem:[%s4057_s5] sm:$0xff]  ;;  %s4109_s29 = sld [smem:[#allocation18_spill]] }
  0x41   : > { %v3230_v40 = vld [vmem:[%s3082_s21 + $0x30] sm:$0xff]  ;;  %v3235_v41 = vld [vmem:[%s3082_s21 + $0x38] sm:$0xff]  ;;  %s4113_s1 = sld [smem:[#allocation21_spill]]  ;;  %s2725_s24 = sshll.u32 %s3012_s0, 6 }
  0x42   : > { %s630_s17 = scalar_lea.vmem %s4106_s16, %s2723_s15  ;;  %929 = vmatpush.msra.mxu3 %v865_v37  ;;  %s4112_s16 = sld [smem:[#allocation19_spill]] }
  0x43   : > { %v661_v0 = vld [vmem:[%s4107_s3 + $0x8] sm:$0xff]  ;;  %v660_v1 = vld [vmem:[%s4107_s3] sm:$0xff]  ;;  %v638_v4 = vld [vmem:[%s630_s17 + $0x10] sm:$0xff]  ;;  %s4114_s27 = sld [smem:[#allocation22_spill]] }
  0x44   : > { %701 = vmatpush.msra.mxu0 %v661_v0  ;;  %v636_v2 = vld [vmem:[%s630_s17] sm:$0xff]  ;;  %v637_v3 = vld [vmem:[%s630_s17 + $0x8] sm:$0xff]  ;;  %v639_v5 = vld [vmem:[%s630_s17 + $0x18] sm:$0xff]  ;;  %930 = vmatpush.msra.mxu3 %v864_v38 }
  0x45   : > { %v640_v9 = vld [vmem:[%s630_s17 + $0x20] sm:$0xff]  ;;  %v641_v10 = vld [vmem:[%s630_s17 + $0x28] sm:$0xff]  ;;  %v642_v11 = vld [vmem:[%s630_s17 + $0x30] sm:$0xff]  ;;  %s3138_s2 = scalar_lea.vmem %s4108_s23, %s2723_s15  ;;  %s2328_s15 = scalar_lea.sflag [#allocation4], %s3076_s20 }
  0x46   : > { %702 = vmatpush.msra.mxu0 %v660_v1  ;;  %v643_v12 = vld [vmem:[%s630_s17 + $0x38] sm:$0xff]  ;;  %v3141_v22 = vld [vmem:[%s3138_s2] sm:$0xff]  ;;  %v3144_v23 = vld [vmem:[%s3138_s2 + $0x10] sm:$0xff]  ;;  %931 = vmatpush.msra.mxu3 %v863_v39  ;;  %s4110_s19 = smov %s4109_s29  ;;  %s4111_s17 = sld [smem:[#allocation20_spill]] }
  0x47   : > { %2453 = vmatmul.msk.f32.vlgmr.msra.gmra.mxu0 %vm662_vm0, %v636_v2  ;;  %v3152_v24 = vld [vmem:[%s3138_s2 + $0x8] sm:$0xff]  ;;  %v3155_v25 = vld [vmem:[%s3138_s2 + $0x18] sm:$0xff]  ;;  %v3163_v26 = vld [vmem:[%s3138_s2 + $0x20] sm:$0xff] }
  0x48   : > { %1017 = vmatpush.msrb.mxu0 %v862_v6  ;;  %v3169_v27 = vld [vmem:[%s3138_s2 + $0x28] sm:$0xff]  ;;  %v3175_v28 = vld [vmem:[%s3138_s2 + $0x30] sm:$0xff]  ;;  %v3181_v29 = vld [vmem:[%s3138_s2 + $0x38] sm:$0xff]  ;;  %s2340_s2 = sshll.u32 %s4009_s25, 4  ;;  %s2341_s2 = int_to_ptr.vmem [resolvable:$true] %s2340_s2 }
  0x49   : > { %s4115_s21 = smov %s4114_s27  ;;  %s2339_s23 = scalar_lea.hbm %s4114_s27, %s2725_s24 }
  0x4a   : > { %1018 = vmatpush.msrb.mxu0 %v861_v7  ;;  %s2342_s14 = sshll.u32 %s2339_s23, 4  ;;  %s2844_s24 = scalar_lea.hbm %s4115_s21, 256  ;;  %s2343_s14 = int_to_ptr.hbm [resolvable:$true] %s2342_s14 }
  0x4b   : > { %s2838_s26 = sshra.s32 %s2343_s14, 4  ;;  %s2839_s26 = int_to_ptr.hbm [resolvable:$true] %s2838_s26 }
  0x4c   : > { %1019 = vmatpush.msrb.mxu0 %v860_v8  ;;  %s2840_s0 = scalar_lea.hbm %s2839_s26, 64  ;;  %p2845_p2 = scmp.lt.s32.totalorder %s2839_s26, %s4115_s21 }
  0x4d   : > { %p2841_p6 = scmp.ne.s32.totalorder %s2839_s26, %s2840_s0  ;;  %p2846_p3 = scmp.lt.s32.totalorder %s2844_s24, %s2840_s0 }
  0x4e   : > { %1020 = vmatpush.msrb.mxu0 %v859_v13 }
  0x4f   : > { %2454 = vmatmul.msk.f32.gmra.mxu0 %vm662_vm0, %v637_v3  ;;  %p2842_p13 = pnand %p2841_p6, %p3040_p10  ;;  %p2847_p4 = por %p2846_p3, %p2845_p2 }
  0x51   : > { %p2843_p0 = pneg %p2842_p13 }
  0x53   : > { %p2848_p5 = pnand %p2847_p4, %p2843_p0 }
  0x57   : > { %2455 = vmatmul.msk.f32.gmra.mxu0 %vm662_vm0, %v638_v4 }
  0x5f   : > { %2456 = vmatmul.msk.f32.gmra.mxu0 %vm662_vm0, %v639_v5 }
  0x67   : > { %2457 = vmatmul.msk.f32.gmra.mxu0 %vm662_vm0, %v640_v9 }
  0x6f   : > { %2458 = vmatmul.msk.f32.gmra.mxu0 %vm662_vm0, %v641_v10 }
  0x77   : > { %2459 = vmatmul.msk.f32.gmra.mxu0 %vm662_vm0, %v642_v11 }
  0x7f   : > { %2460 = vmatmul.msk.f32.gmra.mxu0 %vm662_vm0, %v643_v12  ;;  %v3260_v12 = vld [vmem:[%s4058_s6] ss:$0 sm:$0xff] }
  0xc4   : > { %v704_v14 = vpop.f32.mrf.mxu0 }
  0xc5   : > { %2493 = vmatmul.msk.f32.vlgmr.msrb.gmra.mxu0 %vm867_vm1, %v704_v14 }
  0xcc   : > { %v707_v15 = vpop.f32.mrf.mxu0 }
  0xcd   : > { %2494 = vmatmul.msk.f32.gmra.mxu0 %vm867_vm1, %v707_v15 }
  0xd4   : > { %v710_v16 = vpop.f32.mrf.mxu0 }
  0xd5   : > { %2495 = vmatmul.msk.f32.gmra.mxu0 %vm867_vm1, %v710_v16 }
  0xdc   : > { %v713_v17 = vpop.f32.mrf.mxu0 }
  0xdd   : > { %2496 = vmatmul.msk.f32.gmra.mxu0 %vm867_vm1, %v713_v17 }
  0xe4   : > { %v716_v18 = vpop.f32.mrf.mxu0 }
  0xe5   : > { %2497 = vmatmul.msk.f32.gmra.mxu0 %vm867_vm1, %v716_v18 }
  0xec   : > { %v719_v19 = vpop.f32.mrf.mxu0 }
  0xed   : > { %2498 = vmatmul.msk.f32.gmra.mxu0 %vm867_vm1, %v719_v19 }
  0xf4   : > { %v722_v20 = vpop.f32.mrf.mxu0 }
  0xf5   : > { %2499 = vmatmul.msk.f32.gmra.mxu0 %vm867_vm1, %v722_v20 }
  0xfc   : > { %v725_v21 = vpop.f32.mrf.mxu0 }
  0xfd   : > { %761 = vmatpush.msra.mxu1 %v725_v21  ;;  %2726 = vmatpush.msra.mxu2 %v725_v21 }
  0xfe   : > { %2500 = vmatmul.msk.f32.gmra.mxu0 %vm867_vm1, %v725_v21 }
  0xff   : > { %762 = vmatpush.msra.mxu1 %v722_v20  ;;  %2727 = vmatpush.msra.mxu2 %v722_v20 }
 0x101   : > { %763 = vmatpush.msra.mxu1 %v719_v19  ;;  %2728 = vmatpush.msra.mxu2 %v719_v19 }
 0x103   : > { %764 = vmatpush.msra.mxu1 %v716_v18  ;;  %2729 = vmatpush.msra.mxu2 %v716_v18 }
 0x105   : > { %765 = vmatpush.msra.mxu1 %v713_v17  ;;  %2730 = vmatpush.msra.mxu2 %v713_v17 }
 0x106   : > { %2501 = vmatmul.msk.f32.gmra.mxu0 %vm867_vm1, %v704_v14 }
 0x107   : > { %766 = vmatpush.msra.mxu1 %v710_v16  ;;  %2731 = vmatpush.msra.mxu2 %v710_v16 }
 0x109   : > { %767 = vmatpush.msra.mxu1 %v707_v15  ;;  %2732 = vmatpush.msra.mxu2 %v707_v15 }
 0x10b   : > { %768 = vmatpush.msra.mxu1 %v704_v14  ;;  %2733 = vmatpush.msra.mxu2 %v704_v14 }
 0x10c   : > { %2461 = vmatmul.msk.f32.vlgmr.msra.gmra.mxu1 %vm728_vm2, %v3141_v22  ;;  %2463 = vmatmul.msk.f32.vlgmr.msra.gmra.mxu2 %vm728_vm2, %v3144_v23 }
 0x10d   : > { %826 = vmatpush.msrb.mxu2 %v725_v21 }
 0x10e   : > { %2502 = vmatmul.msk.f32.gmra.mxu0 %vm867_vm1, %v707_v15 }
 0x10f   : > { %827 = vmatpush.msrb.mxu2 %v722_v20 }
 0x111   : > { %828 = vmatpush.msrb.mxu2 %v719_v19 }
 0x113   : > { %829 = vmatpush.msrb.mxu2 %v716_v18 }
 0x114   : > { %2462 = vmatmul.msk.f32.gmra.mxu1 %vm728_vm2, %v3152_v24  ;;  %2464 = vmatmul.msk.f32.gmra.mxu2 %vm728_vm2, %v3155_v25 }
 0x115   : > { %830 = vmatpush.msrb.mxu2 %v713_v17 }
 0x116   : > { %2503 = vmatmul.msk.f32.gmra.mxu0 %vm867_vm1, %v710_v16 }
 0x117   : > { %831 = vmatpush.msrb.mxu2 %v710_v16 }
 0x119   : > { %832 = vmatpush.msrb.mxu2 %v707_v15 }
 0x11b   : > { %833 = vmatpush.msrb.mxu2 %v704_v14 }
 0x11c   : > { %2465 = vmatmul.msk.f32.gmra.mxu2 %vm728_vm2, %v3163_v26 }
 0x11e   : > { %2504 = vmatmul.msk.f32.gmra.mxu0 %vm867_vm1, %v713_v17 }
 0x124   : > { %2466 = vmatmul.msk.f32.gmra.mxu2 %vm728_vm2, %v3169_v27 }
 0x126   : > { %2505 = vmatmul.msk.f32.gmra.mxu0 %vm867_vm1, %v716_v18 }
 0x12c   : > { %2467 = vmatmul.msk.f32.gmra.mxu2 %vm728_vm2, %v3175_v28 }
 0x12e   : > { %2506 = vmatmul.msk.f32.gmra.mxu0 %vm867_vm1, %v719_v19 }
 0x134   : > { %2468 = vmatmul.msk.f32.gmra.mxu2 %vm728_vm2, %v3181_v29 }
 0x136   : > { %2507 = vmatmul.msk.f32.gmra.mxu0 %vm867_vm1, %v722_v20 }
 0x13c   : > { %2469 = vmatmul.msk.f32.vlgmr.msrb.gmra.mxu2 %vm728_vm2, %v3187_v30 }
 0x13e   : > { %2508 = vmatmul.msk.f32.gmra.mxu0 %vm867_vm1, %v725_v21 }
 0x142   : > { %v1022_v56 = vpop.f32.mrf.mxu0 }
 0x144   : > { %2470 = vmatmul.msk.f32.gmra.mxu2 %vm728_vm2, %v3193_v31 }
 0x14a   : > { %v1025_v58 = vpop.f32.mrf.mxu0 }
 0x14c   : > { %2471 = vmatmul.msk.f32.gmra.mxu2 %vm728_vm2, %v3198_v32 }
 0x152   : > { %v1028_v60 = vpop.f32.mrf.mxu0 }
 0x154   : > { %2472 = vmatmul.msk.f32.gmra.mxu2 %vm728_vm2, %v3203_v33 }
 0x15a   : > { %v1031_v61 = vpop.f32.mrf.mxu0 }
 0x15c   : > { %2473 = vmatmul.msk.f32.gmra.mxu2 %vm728_vm2, %v3208_v34 }
 0x162   : > { %v1034_v0 = vpop.f32.mrf.mxu0 }
 0x164   : > { %2474 = vmatmul.msk.f32.gmra.mxu2 %vm728_vm2, %v3213_v35 }
 0x16a   : > { %v1037_v2 = vpop.f32.mrf.mxu0 }
 0x16c   : > { %2475 = vmatmul.msk.f32.gmra.mxu2 %vm728_vm2, %v3230_v40 }
 0x172   : > { %v1040_v4 = vpop.f32.mrf.mxu0 }
 0x174   : > { %2476 = vmatmul.msk.f32.gmra.mxu2 %vm728_vm2, %v3235_v41 }
 0x17b   : > { %v1043_v6 = vpop.f32.mrf.mxu0 }
 0x183   : > { %v3255_v9 = vpop.f32.mrf.mxu0 }
 0x189   : > { %v770_v42 = vpop.f32.mrf.mxu1 }
 0x18a   : > { %2477 = vmatmul.msk.f32.vlgmr.msra.gmra.mxu3 %vm867_vm1, %v770_v42 }
 0x18b   : > { %v3266_v18 = vpop.f32.mrf.mxu0 }
 0x18f   : > { %v776_v43 = vpop.f32.mrf.mxu2 }
 0x191   : > { %v773_v44 = vpop.f32.mrf.mxu1 }
 0x192   : > { %2478 = vmatmul.msk.f32.gmra.mxu3 %vm867_vm1, %v773_v44 }
 0x197   : > { %v779_v45 = vpop.f32.mrf.mxu2 }
 0x19a   : > { %2479 = vmatmul.msk.f32.gmra.mxu3 %vm867_vm1, %v776_v43 }
 0x19f   : > { %v782_v46 = vpop.f32.mrf.mxu2 }
 0x1a2   : > { %2480 = vmatmul.msk.f32.gmra.mxu3 %vm867_vm1, %v779_v45 }
 0x1a7   : > { %v785_v47 = vpop.f32.mrf.mxu2 }
 0x1aa   : > { %2481 = vmatmul.msk.f32.gmra.mxu3 %vm867_vm1, %v782_v46  ;;  %v1052_v46 = vpop.f32.mrf.mxu0 }
 0x1af   : > { %v788_v48 = vpop.f32.mrf.mxu2 }
 0x1b2   : > { %2482 = vmatmul.msk.f32.gmra.mxu3 %vm867_vm1, %v785_v47 }
 0x1b7   : > { %v791_v49 = vpop.f32.mrf.mxu2 }
 0x1ba   : > { %2483 = vmatmul.msk.f32.gmra.mxu3 %vm867_vm1, %v788_v48 }
 0x1bf   : > { %v835_v50 = vpop.f32.mrf.mxu2 }
 0x1c2   : > { %2484 = vmatmul.msk.f32.gmra.mxu3 %vm867_vm1, %v791_v49  ;;  %v1055_v49 = vpop.f32.mrf.mxu0 }
 0x1c7   : > { %v838_v51 = vpop.f32.mrf.mxu2 }
 0x1ca   : > { %2485 = vmatmul.msk.f32.gmra.mxu3 %vm867_vm1, %v835_v50 }
 0x1cf   : > { %v841_v52 = vpop.f32.mrf.mxu2 }
 0x1d2   : > { %2486 = vmatmul.msk.f32.gmra.mxu3 %vm867_vm1, %v838_v51 }
 0x1d7   : > { %v844_v53 = vpop.f32.mrf.mxu2 }
 0x1da   : > { %2487 = vmatmul.msk.f32.gmra.mxu3 %vm867_vm1, %v841_v52  ;;  %v1058_v52 = vpop.f32.mrf.mxu0 }
 0x1df   : > { %v847_v54 = vpop.f32.mrf.mxu2 }
 0x1e2   : > { %2488 = vmatmul.msk.f32.gmra.mxu3 %vm867_vm1, %v844_v53 }
 0x1e7   : > { %v850_v55 = vpop.f32.mrf.mxu2 }
 0x1ea   : > { %2489 = vmatmul.msk.f32.gmra.mxu3 %vm867_vm1, %v847_v54  ;;  %v1061_v54 = vpop.f32.mrf.mxu0 }
 0x1ef   : > { %v853_v57 = vpop.f32.mrf.mxu2 }
 0x1f2   : > { %2490 = vmatmul.msk.f32.gmra.mxu3 %vm867_vm1, %v850_v55 }
 0x1f7   : > { %v856_v59 = vpop.f32.mrf.mxu2 }
 0x1fa   : > { %2491 = vmatmul.msk.f32.gmra.mxu3 %vm867_vm1, %v853_v57 }
 0x202   : > { %2492 = vmatmul.msk.f32.gmra.mxu3 %vm867_vm1, %v856_v59 }
 0x20d   : > { %v933_v62 = vpop.f32.mrf.mxu3 }
 0x20e   : > { %v1023_v43 = vadd.f32 %v1022_v56, %v933_v62  ;;  %v1064_v56 = vpop.f32.mrf.mxu0 }
 0x210   : > { %v3304_v47 = vadd.f32 %v3260_v12, %v1023_v43 }
 0x212   : > { %vm1090_vm10 = vcmp.ge.f32.partialorder %v3304_v47, 0.0 }
 0x215   : > { %v936_v63 = vpop.f32.mrf.mxu3 }
 0x216   : > { %v1026_v39 = vadd.f32 %v1025_v58, %v936_v63  ;;  %v1067_v58 = vpop.f32.mrf.mxu0 }
 0x218   : > { %v3297_v45 = vadd.f32 %v3260_v12, %v1026_v39 }
 0x21a   : > { %vm1091_vm9 = vcmp.ge.f32.partialorder %v3297_v45, 0.0 }
 0x21d   : > { %v939_v1 = vpop.f32.mrf.mxu3 }
 0x21e   : > { %v1029_v36 = vadd.f32 %v1028_v60, %v939_v1 }
 0x220   : > { %v3290_v44 = vadd.f32 %v3260_v12, %v1029_v36 }
 0x222   : > { %vm1092_vm8 = vcmp.ge.f32.partialorder %v3290_v44, 0.0 }
 0x223   : > { %v1100_v43 = vsel %vm1092_vm8, %v3290_v44, 0.0 }
 0x225   : > { %v942_v3 = vpop.f32.mrf.mxu3 }
 0x226   : > { %v1032_v19 = vadd.f32 %v1031_v61, %v942_v3 }
 0x228   : > { %v3283_v42 = vadd.f32 %v3260_v12, %v1032_v19  ;;  %v1098_v19 = vsel %vm1090_vm10, %v3304_v47, 0.0 }
 0x22a   : > { %vm1093_vm7 = vcmp.ge.f32.partialorder %v3283_v42, 0.0 }
 0x22d   : > { %v945_v5 = vpop.f32.mrf.mxu3 }
 0x22e   : > { %v1035_v15 = vadd.f32 %v1034_v0, %v945_v5 }
 0x230   : > { %v3276_v37 = vadd.f32 %v3260_v12, %v1035_v15  ;;  %v1197_v15 = vld [vmem:[%s4059_s7 + $0x8] sm:$0xff] }
 0x232   : > { %vm1094_vm6 = vcmp.ge.f32.partialorder %v3276_v37, 0.0 }
 0x235   : > { %v948_v7 = vpop.f32.mrf.mxu3 }
 0x236   : > { %v1038_v13 = vadd.f32 %v1037_v2, %v948_v7 }
 0x238   : > { %v3269_v20 = vadd.f32 %v3260_v12, %v1038_v13 }
 0x23a   : > { %vm1095_vm5 = vcmp.ge.f32.partialorder %v3269_v20, 0.0 }
 0x23d   : > { %v951_v8 = vpop.f32.mrf.mxu3 }
 0x23e   : > { %v1041_v10 = vadd.f32 %v1040_v4, %v951_v8 }
 0x240   : > { %v3263_v16 = vadd.f32 %v3260_v12, %v1041_v10 }
 0x242   : > { %vm1096_vm4 = vcmp.ge.f32.partialorder %v3263_v16, 0.0 }
 0x245   : > { %v954_v11 = vpop.f32.mrf.mxu3 }
 0x246   : > { %v1044_v14 = vadd.f32 %v1043_v6, %v954_v11 }
 0x248   : > { %v1081_v17 = vadd.f32 %v3260_v12, %v1044_v14 }
 0x24a   : > { %vm1097_vm3 = vcmp.ge.f32.partialorder %v1081_v17, 0.0 }
 0x24b   : > { %2509 = vmatpush.msk.msrb.mxu1 %vm1097_vm3, %v1081_v17  ;;  %v3273_v21 = vsel %vm1097_vm3, %v1081_v17, 0.0  ;;  %v1196_v17 = vld [vmem:[%s4059_s7] sm:$0xff] }
 0x24d   : > { %v957_v38 = vpop.f32.mrf.mxu3  ;;  %2510 = vmatpush.msk.msrb.mxu1 %vm1096_vm4, %v3263_v16 }
 0x24e   : > { %v1047_v10 = vadd.f32 %v3255_v9, %v957_v38  ;;  %v1199_v9 = vld [vmem:[%s4060_s8 + $0x8] sm:$0xff]  ;;  %v1099_v38 = vsel %vm1091_vm9, %v3297_v45, 0.0 }
 0x24f   : > { %2511 = vmatpush.msk.msrb.mxu1 %vm1095_vm5, %v3269_v20  ;;  %2734 = vmatpush.msrb.mxu3 %v1199_v9 }
 0x250   : > { %v1082_v14 = vadd.f32 %v3260_v12, %v1047_v10 }
 0x251   : > { %2512 = vmatpush.msk.msrb.mxu1 %vm1094_vm6, %v3276_v37 }
 0x253   : > { %2513 = vmatpush.msk.msrb.mxu1 %vm1093_vm7, %v3283_v42 }
 0x255   : > { %v960_v48 = vpop.f32.mrf.mxu3  ;;  %2514 = vmatpush.msk.msrb.mxu1 %vm1092_vm8, %v3290_v44 }
 0x256   : > { %v1050_v7 = vadd.f32 %v3266_v18, %v960_v48  ;;  %v1101_v48 = vsel %vm1093_vm7, %v3283_v42, 0.0 }
 0x257   : > { %2515 = vmatpush.msk.msrb.mxu1 %vm1091_vm9, %v3297_v45 }
 0x258   : > { %v1083_v13 = vadd.f32 %v3260_v12, %v1050_v7 }
 0x259   : > { %2516 = vmatpush.msk.msrb.mxu1 %vm1090_vm10, %v3304_v47 }
 0x25a   : > { %2517 = vmatmul.msk.f32.vlgmr.msrb.gmra.mxu1 %vm728_vm2, %v3141_v22 }
 0x25b   : > { %1262 = vmatpush.msra.mxu1 %v1199_v9 }
 0x25d   : > { %v963_v50 = vpop.f32.mrf.mxu3 }
 0x25e   : > { %v1053_v5 = vadd.f32 %v1052_v46, %v963_v50  ;;  %v1102_v50 = vsel %vm1094_vm6, %v3276_v37, 0.0 }
 0x260   : > { %v3361_v11 = vadd.f32 %v3260_v12, %v1053_v5 }
 0x262   : > { %2518 = vmatmul.msk.f32.gmra.mxu1 %vm728_vm2, %v3152_v24 }
 0x265   : > { %v966_v51 = vpop.f32.mrf.mxu3 }
 0x266   : > { %v1056_v3 = vadd.f32 %v1055_v49, %v966_v51 }
 0x268   : > { %v3354_v8 = vadd.f32 %v3260_v12, %v1056_v3 }
 0x26a   : > { %2519 = vmatmul.msk.f32.gmra.mxu1 %vm728_vm2, %v3144_v23 }
 0x26d   : > { %v969_v53 = vpop.f32.mrf.mxu3 }
 0x26e   : > { %v1059_v0 = vadd.f32 %v1058_v52, %v969_v53  ;;  %v1103_v52 = vsel %vm1095_vm5, %v3269_v20, 0.0 }
 0x270   : > { %v3347_v6 = vadd.f32 %v3260_v12, %v1059_v0 }
 0x272   : > { %2520 = vmatmul.msk.f32.gmra.mxu1 %vm728_vm2, %v3155_v25 }
 0x275   : > { %v972_v55 = vpop.f32.mrf.mxu3 }
 0x276   : > { %v1062_v62 = vadd.f32 %v1061_v54, %v972_v55  ;;  %v1104_v54 = vsel %vm1096_vm4, %v3263_v16, 0.0 }
 0x278   : > { %v3341_v4 = vadd.f32 %v3260_v12, %v1062_v62  ;;  %v1110_v62 = vsel %vm1094_vm6, %v3347_v6, 0.0 }
 0x27a   : > { %2521 = vmatmul.msk.f32.gmra.mxu1 %vm728_vm2, %v3163_v26 }
 0x27d   : > { %v975_v57 = vpop.f32.mrf.mxu3 }
 0x27e   : > { %v1065_v60 = vadd.f32 %v1064_v56, %v975_v57  ;;  %v1106_v57 = vsel %vm1090_vm10, %v1082_v14, 0.0 }
 0x280   : > { %v3332_v1 = vadd.f32 %v3260_v12, %v1065_v60 }
 0x282   : > { %2522 = vmatmul.msk.f32.gmra.mxu1 %vm728_vm2, %v3169_v27  ;;  %v1112_v0 = vsel %vm1096_vm4, %v3332_v1, 0.0 }
 0x285   : > { %v978_v59 = vpop.f32.mrf.mxu3 }
 0x286   : > { %v1068_v61 = vadd.f32 %v1067_v58, %v978_v59  ;;  %v1107_v59 = vsel %vm1091_vm9, %v1083_v13, 0.0 }
 0x288   : > { %v1089_v63 = vadd.f32 %v3260_v12, %v1068_v61  ;;  %v1198_v12 = vld [vmem:[%s4060_s8] sm:$0xff]  ;;  %v1109_v61 = vsel %vm1093_vm7, %v3354_v8, 0.0 }
 0x289   : > { %1263 = vmatpush.msra.mxu1 %v1198_v12  ;;  %2735 = vmatpush.msrb.mxu3 %v1198_v12 }
 0x28a   : > { %2525 = vmatpush.msk.msra.mxu2 %vm1097_vm3, %v1089_v63  ;;  %2523 = vmatmul.msk.f32.gmra.mxu1 %vm728_vm2, %v3175_v28  ;;  %v3338_v2 = vsel %vm1097_vm3, %v1089_v63, 0.0  ;;  %v1111_v63 = vsel %vm1095_vm5, %v3341_v4, 0.0 }
 0x28b   : > { %1375 = vmatpush.msrb.mxu1 %v1197_v15 }
 0x28c   : > { %2526 = vmatpush.msk.msra.mxu2 %vm1096_vm4, %v3332_v1 }
 0x28d   : > { %1376 = vmatpush.msrb.mxu1 %v1196_v17 }
 0x28e   : > { %2527 = vmatpush.msk.msra.mxu2 %vm1095_vm5, %v3341_v4 }
 0x290   : > { %2528 = vmatpush.msk.msra.mxu2 %vm1094_vm6, %v3347_v6  ;;  %vm1554_vm6 = vcmask 64512  }
 0x292   : > { %2529 = vmatpush.msk.msra.mxu2 %vm1093_vm7, %v3354_v8  ;;  %2524 = vmatmul.msk.f32.gmra.mxu1 %vm728_vm2, %v3181_v29 }
 0x294   : > { %2530 = vmatpush.msk.msra.mxu2 %vm1092_vm8, %v3361_v11 }
 0x296   : > { %2531 = vmatpush.msk.msra.mxu2 %vm1091_vm9, %v1083_v13 }
 0x298   : > { %2532 = vmatpush.msk.msra.mxu2 %vm1090_vm10, %v1082_v14 }
 0x299   : > { %2533 = vmatmul.msk.f32.vlgmr.msra.gmra.mxu2 %vm728_vm2, %v3187_v30 }
 0x2a1   : > { %2534 = vmatmul.msk.f32.gmra.mxu2 %vm728_vm2, %v3193_v31 }
 0x2a9   : > { %2535 = vmatmul.msk.f32.gmra.mxu2 %vm728_vm2, %v3198_v32 }
 0x2b1   : > { %2536 = vmatmul.msk.f32.gmra.mxu2 %vm728_vm2, %v3203_v33 }
 0x2b9   : > { %2537 = vmatmul.msk.f32.gmra.mxu2 %vm728_vm2, %v3208_v34 }
 0x2c1   : > { %2538 = vmatmul.msk.f32.gmra.mxu2 %vm728_vm2, %v3213_v35 }
 0x2c9   : > { %2539 = vmatmul.msk.f32.gmra.mxu2 %vm728_vm2, %v3230_v40 }
 0x2d1   : > { %2540 = vmatmul.msk.f32.gmra.mxu2 %vm728_vm2, %v3235_v41 }
 0x2d7   : > { %v1131_v18 = vpop.f32.mrf.mxu1 }
 0x2d8   : > { %2541 = vmatmul.msk.f32.vlgmr.msra.gmra.mxu1 %vm662_vm0, %v1131_v18 }
 0x2df   : > { %v1134_v36 = vpop.f32.mrf.mxu1 }
 0x2e0   : > { %2557 = vmatmul.msk.f32.vlgmr.msrb.gmra.mxu1 %vm662_vm0, %v1098_v19  ;;  %2542 = vmatmul.msk.f32.vlgmr.msrb.gmra.mxu3 %vm662_vm0, %v1134_v36 }
 0x2e7   : > { %v1137_v39 = vpop.f32.mrf.mxu1 }
 0x2e8   : > { %2558 = vmatmul.msk.f32.gmra.mxu1 %vm662_vm0, %v1099_v38  ;;  %2543 = vmatmul.msk.f32.gmra.mxu3 %vm662_vm0, %v1137_v39 }
 0x2ef   : > { %v1140_v46 = vpop.f32.mrf.mxu1 }
 0x2f0   : > { %2559 = vmatmul.msk.f32.gmra.mxu1 %vm662_vm0, %v1100_v43  ;;  %2544 = vmatmul.msk.f32.gmra.mxu3 %vm662_vm0, %v1140_v46 }
 0x2f7   : > { %v1143_v49 = vpop.f32.mrf.mxu1 }
 0x2f8   : > { %2560 = vmatmul.msk.f32.gmra.mxu1 %vm662_vm0, %v1101_v48  ;;  %2545 = vmatmul.msk.f32.gmra.mxu3 %vm662_vm0, %v1143_v49 }
 0x2ff   : > { %v1146_v51 = vpop.f32.mrf.mxu1 }
 0x300   : > { %2561 = vmatmul.msk.f32.gmra.mxu1 %vm662_vm0, %v1102_v50  ;;  %2546 = vmatmul.msk.f32.gmra.mxu3 %vm662_vm0, %v1146_v51 }
 0x307   : > { %v1149_v53 = vpop.f32.mrf.mxu1 }
 0x308   : > { %2562 = vmatmul.msk.f32.gmra.mxu1 %vm662_vm0, %v1103_v52  ;;  %2547 = vmatmul.msk.f32.gmra.mxu3 %vm662_vm0, %v1149_v53 }
 0x30f   : > { %v1152_v55 = vpop.f32.mrf.mxu1 }
 0x310   : > { %2563 = vmatmul.msk.f32.gmra.mxu1 %vm662_vm0, %v1104_v54  ;;  %2548 = vmatmul.msk.f32.gmra.mxu3 %vm662_vm0, %v1152_v55 }
 0x318   : > { %2564 = vmatmul.msk.f32.gmra.mxu1 %vm662_vm0, %v3273_v21  ;;  %v1108_v21 = vsel %vm1092_vm8, %v3361_v11, 0.0 }
 0x31c   : > { %v1172_v56 = vpop.f32.mrf.mxu2 }
 0x31d   : > { %2549 = vmatmul.msk.f32.gmra.mxu3 %vm662_vm0, %v1172_v56 }
 0x320   : > { %2565 = vmatmul.msk.f32.gmra.mxu1 %vm662_vm0, %v1106_v57 }
 0x324   : > { %v1175_v58 = vpop.f32.mrf.mxu2 }
 0x325   : > { %2550 = vmatmul.msk.f32.gmra.mxu3 %vm662_vm0, %v1175_v58 }
 0x328   : > { %2566 = vmatmul.msk.f32.gmra.mxu1 %vm662_vm0, %v1107_v59 }
 0x32c   : > { %v1178_v60 = vpop.f32.mrf.mxu2 }
 0x32d   : > { %2551 = vmatmul.msk.f32.gmra.mxu3 %vm662_vm0, %v1178_v60 }
 0x330   : > { %2567 = vmatmul.msk.f32.gmra.mxu1 %vm662_vm0, %v1108_v21 }
 0x334   : > { %v1181_v47 = vpop.f32.mrf.mxu2 }
 0x335   : > { %2552 = vmatmul.msk.f32.gmra.mxu3 %vm662_vm0, %v1181_v47 }
 0x338   : > { %2568 = vmatmul.msk.f32.gmra.mxu1 %vm662_vm0, %v1109_v61 }
 0x33c   : > { %v1184_v45 = vpop.f32.mrf.mxu2 }
 0x33d   : > { %2553 = vmatmul.msk.f32.gmra.mxu3 %vm662_vm0, %v1184_v45 }
 0x340   : > { %2569 = vmatmul.msk.f32.gmra.mxu1 %vm662_vm0, %v1110_v62 }
 0x344   : > { %v1187_v44 = vpop.f32.mrf.mxu2 }
 0x345   : > { %2554 = vmatmul.msk.f32.gmra.mxu3 %vm662_vm0, %v1187_v44 }
 0x348   : > { %2570 = vmatmul.msk.f32.gmra.mxu1 %vm662_vm0, %v1111_v63 }
 0x34c   : > { %v1190_v42 = vpop.f32.mrf.mxu2 }
 0x34d   : > { %2555 = vmatmul.msk.f32.gmra.mxu3 %vm662_vm0, %v1190_v42 }
 0x350   : > { %2571 = vmatmul.msk.f32.gmra.mxu1 %vm662_vm0, %v1112_v0 }
 0x354   : > { %v1193_v37 = vpop.f32.mrf.mxu2 }
 0x355   : > { %v1265_v3 = vpop.f32.mrf.mxu1  ;;  %2556 = vmatmul.msk.f32.gmra.mxu3 %vm662_vm0, %v1193_v37 }
 0x358   : > { %2572 = vmatmul.msk.f32.gmra.mxu1 %vm662_vm0, %v3338_v2  ;;  %v3482_v2 = vld [vmem:[%s4061_s9] ss:$0 sm:$0xff] }
 0x35d   : > { %v1378_v20 = vpop.f32.mrf.mxu1 }
 0x35e   : > { %v1379_v53 = vadd.f32 %v1378_v20, %v1265_v3 }
 0x360   : > { %v3526_v57 = vadd.f32 %v3482_v2, %v1379_v53 }
 0x362   : > { %vm1446_vm5 = vcmp.ge.f32.partialorder %v3526_v57, 0.0 }
 0x363   : > { %v1268_v4 = vpop.f32.mrf.mxu3 }
 0x365   : > { %v1381_v5 = vpop.f32.mrf.mxu1 }
 0x366   : > { %v1382_v51 = vadd.f32 %v1381_v5, %v1268_v4 }
 0x368   : > { %v3519_v56 = vadd.f32 %v3482_v2, %v1382_v51 }
 0x36a   : > { %vm1447_vm4 = vcmp.ge.f32.partialorder %v3519_v56, 0.0 }
 0x36b   : > { %v1271_v6 = vpop.f32.mrf.mxu3 }
 0x36d   : > { %v1384_v7 = vpop.f32.mrf.mxu1 }
 0x36e   : > { %v1385_v48 = vadd.f32 %v1384_v7, %v1271_v6 }
 0x370   : > { %v3512_v54 = vadd.f32 %v3482_v2, %v1385_v48 }
 0x372   : > { %vm1448_vm3 = vcmp.ge.f32.partialorder %v3512_v54, 0.0 }
 0x373   : > { %v1274_v8 = vpop.f32.mrf.mxu3 }
 0x375   : > { %v1387_v10 = vpop.f32.mrf.mxu1 }
 0x376   : > { %v1388_v43 = vadd.f32 %v1387_v10, %v1274_v8 }
 0x378   : > { %v3505_v52 = vadd.f32 %v3482_v2, %v1388_v43  ;;  %v1455_v43 = vsel %vm1447_vm4, %v3519_v56, 0.0 }
 0x37a   : > { %vm1449_vm15 = vcmp.ge.f32.partialorder %v3505_v52, 0.0 }
 0x37b   : > { %v1277_v11 = vpop.f32.mrf.mxu3  ;;  %v1457_v53 = vsel %vm1449_vm15, %v3505_v52, 0.0 }
 0x37d   : > { %v1390_v13 = vpop.f32.mrf.mxu1 }
 0x37e   : > { %v1391_v36 = vadd.f32 %v1390_v13, %v1277_v11 }
 0x380   : > { %v3498_v49 = vadd.f32 %v3482_v2, %v1391_v36 }
 0x382   : > { %vm1450_vm14 = vcmp.ge.f32.partialorder %v3498_v49, 0.0 }
 0x383   : > { %v1280_v16 = vpop.f32.mrf.mxu3 }
 0x385   : > { %v1393_v1 = vpop.f32.mrf.mxu1 }
 0x386   : > { %v1394_v18 = vadd.f32 %v1393_v1, %v1280_v16 }
 0x388   : > { %v3491_v46 = vadd.f32 %v3482_v2, %v1394_v18  ;;  %v1553_v18 = vld [vmem:[%s4063_s11] sm:$0xff] }
 0x38a   : > { %vm1451_vm13 = vcmp.ge.f32.partialorder %v3491_v46, 0.0 }
 0x38b   : > { %v1283_v14 = vpop.f32.mrf.mxu3 }
 0x38d   : > { %v1396_v9 = vpop.f32.mrf.mxu1 }
 0x38e   : > { %v1397_v15 = vadd.f32 %v1396_v9, %v1283_v14 }
 0x390   : > { %v3485_v38 = vadd.f32 %v3482_v2, %v1397_v15 }
 0x392   : > { %vm1452_vm12 = vcmp.ge.f32.partialorder %v3485_v38, 0.0 }
 0x393   : > { %v1286_v12 = vpop.f32.mrf.mxu3 }
 0x395   : > { %v1399_v17 = vpop.f32.mrf.mxu1 }
 0x396   : > { %v1400_v19 = vadd.f32 %v1399_v17, %v1286_v12 }
 0x398   : > { %v3488_v39 = vadd.f32 %v3482_v2, %v1400_v19  ;;  %v1454_v19 = vsel %vm1446_vm5, %v3526_v57, 0.0 }
 0x39a   : > { %vm1453_vm11 = vcmp.ge.f32.partialorder %v3488_v39, 0.0 }
 0x39b   : > { %2573 = vmatpush.msk.msrb.mxu2 %vm1453_vm11, %v3488_v39 }
 0x39d   : > { %v1402_v50 = vpop.f32.mrf.mxu1  ;;  %2574 = vmatpush.msk.msrb.mxu2 %vm1452_vm12, %v3485_v38 }
 0x39f   : > { %2575 = vmatpush.msk.msrb.mxu2 %vm1451_vm13, %v3491_v46 }
 0x3a0   : > { %v1289_v55 = vpop.f32.mrf.mxu3 }
 0x3a1   : > { %2576 = vmatpush.msk.msrb.mxu2 %vm1450_vm14, %v3498_v49  ;;  %v1403_v9 = vadd.f32 %v1402_v50, %v1289_v55  ;;  %v1456_v50 = vsel %vm1448_vm3, %v3512_v54, 0.0 }
 0x3a3   : > { %2577 = vmatpush.msk.msrb.mxu2 %vm1449_vm15, %v3505_v52  ;;  %v1438_v17 = vadd.f32 %v3482_v2, %v1403_v9 }
 0x3a5   : > { %v1405_v58 = vpop.f32.mrf.mxu1  ;;  %2578 = vmatpush.msk.msrb.mxu2 %vm1448_vm3, %v3512_v54 }
 0x3a7   : > { %2579 = vmatpush.msk.msrb.mxu2 %vm1447_vm4, %v3519_v56 }
 0x3a8   : > { %v1292_v59 = vpop.f32.mrf.mxu3 }
 0x3a9   : > { %2580 = vmatpush.msk.msrb.mxu2 %vm1446_vm5, %v3526_v57  ;;  %v1406_v1 = vadd.f32 %v1405_v58, %v1292_v59  ;;  %v1458_v58 = vsel %vm1450_vm14, %v3498_v49, 0.0 }
 0x3aa   : > { %2581 = vmatmul.msk.f32.vlgmr.msrb.gmra.mxu2 %vm728_vm2, %v3141_v22 }
 0x3ab   : > { %v1439_v15 = vadd.f32 %v3482_v2, %v1406_v1  ;;  %1618 = vmatpush.msra.mxu2 %v1553_v18 }
 0x3ad   : > { %v1408_v60 = vpop.f32.mrf.mxu1 }
 0x3b0   : > { %v1295_v21 = vpop.f32.mrf.mxu3 }
 0x3b1   : > { %v1409_v13 = vadd.f32 %v1408_v60, %v1295_v21  ;;  %v1459_v60 = vsel %vm1451_vm13, %v3491_v46, 0.0 }
 0x3b2   : > { %2582 = vmatmul.msk.f32.gmra.mxu2 %vm728_vm2, %v3152_v24 }
 0x3b3   : > { %v1440_v12 = vadd.f32 %v3482_v2, %v1409_v13 }
 0x3b5   : > { %v1411_v47 = vpop.f32.mrf.mxu1 }
 0x3b8   : > { %v1298_v61 = vpop.f32.mrf.mxu3 }
 0x3b9   : > { %v1412_v10 = vadd.f32 %v1411_v47, %v1298_v61  ;;  %v1460_v47 = vsel %vm1452_vm12, %v3485_v38, 0.0 }
 0x3ba   : > { %2583 = vmatmul.msk.f32.gmra.mxu2 %vm728_vm2, %v3144_v23 }
 0x3bb   : > { %v3578_v14 = vadd.f32 %v3482_v2, %v1412_v10 }
 0x3bd   : > { %v1414_v45 = vpop.f32.mrf.mxu1 }
 0x3c0   : > { %v1301_v62 = vpop.f32.mrf.mxu3 }
 0x3c1   : > { %v1415_v7 = vadd.f32 %v1414_v45, %v1301_v62  ;;  %v1461_v45 = vsel %vm1453_vm11, %v3488_v39, 0.0 }
 0x3c2   : > { %2584 = vmatmul.msk.f32.gmra.mxu2 %vm728_vm2, %v3155_v25 }
 0x3c3   : > { %v3570_v16 = vadd.f32 %v3482_v2, %v1415_v7 }
 0x3c5   : > { %v1417_v44 = vpop.f32.mrf.mxu1 }
 0x3c8   : > { %v1304_v63 = vpop.f32.mrf.mxu3 }
 0x3c9   : > { %v1418_v5 = vadd.f32 %v1417_v44, %v1304_v63  ;;  %v1462_v63 = vsel %vm1446_vm5, %v1438_v17, 0.0 }
 0x3ca   : > { %2585 = vmatmul.msk.f32.gmra.mxu2 %vm728_vm2, %v3163_v26 }
 0x3cb   : > { %v3564_v11 = vadd.f32 %v3482_v2, %v1418_v5 }
 0x3cd   : > { %v1420_v42 = vpop.f32.mrf.mxu1  ;;  %v1467_v5 = vsel %vm1451_vm13, %v3564_v11, 0.0 }
 0x3d0   : > { %v1307_v0 = vpop.f32.mrf.mxu3 }
 0x3d1   : > { %v1421_v20 = vadd.f32 %v1420_v42, %v1307_v0  ;;  %v1463_v0 = vsel %vm1447_vm4, %v1439_v15, 0.0 }
 0x3d2   : > { %2586 = vmatmul.msk.f32.gmra.mxu2 %vm728_vm2, %v3169_v27 }
 0x3d3   : > { %v3558_v8 = vadd.f32 %v3482_v2, %v1421_v20  ;;  %v1465_v20 = vsel %vm1449_vm15, %v3578_v14, 0.0 }
 0x3d5   : > { %v1423_v37 = vpop.f32.mrf.mxu1  ;;  %v1468_v7 = vsel %vm1452_vm12, %v3558_v8, 0.0 }
 0x3d8   : > { %v1310_v3 = vpop.f32.mrf.mxu3 }
 0x3d9   : > { %v1424_v4 = vadd.f32 %v1423_v37, %v1310_v3  ;;  %v1464_v3 = vsel %vm1448_vm3, %v1440_v12, 0.0 }
 0x3da   : > { %2587 = vmatmul.msk.f32.gmra.mxu2 %vm728_vm2, %v3175_v28 }
 0x3db   : > { %v3555_v6 = vadd.f32 %v3482_v2, %v1424_v4  ;;  %v1552_v2 = vld [vmem:[%s4062_s10] sm:$0xff]  ;;  %v1466_v4 = vsel %vm1450_vm14, %v3570_v16, 0.0 }
 0x3dd   : > { %2589 = vmatpush.msk.msra.mxu0 %vm1453_vm11, %v3555_v6  ;;  %v1469_v10 = vsel %vm1453_vm11, %v3555_v6, 0.0 }
 0x3df   : > { %2590 = vmatpush.msk.msra.mxu0 %vm1452_vm12, %v3558_v8 }
 0x3e1   : > { %2591 = vmatpush.msk.msra.mxu0 %vm1451_vm13, %v3564_v11 }
 0x3e2   : > { %2588 = vmatmul.msk.f32.gmra.mxu2 %vm728_vm2, %v3181_v29 }
 0x3e3   : > { %2592 = vmatpush.msk.msra.mxu0 %vm1450_vm14, %v3570_v16 }
 0x3e5   : > { %2593 = vmatpush.msk.msra.mxu0 %vm1449_vm15, %v3578_v14 }
 0x3e7   : > { %2594 = vmatpush.msk.msra.mxu0 %vm1448_vm3, %v1440_v12 }
 0x3e9   : > { %2595 = vmatpush.msk.msra.mxu0 %vm1447_vm4, %v1439_v15 }
 0x3eb   : > { %2596 = vmatpush.msk.msra.mxu0 %vm1446_vm5, %v1438_v17 }
 0x3ec   : > { %2597 = vmatmul.msk.f32.vlgmr.msra.gmra.mxu0 %vm728_vm2, %v3187_v30 }
 0x3ed   : > { %1731 = vmatpush.msrb.mxu0 %v1552_v2 }
 0x3f4   : > { %2598 = vmatmul.msk.f32.gmra.mxu0 %vm728_vm2, %v3193_v31 }
 0x3fc   : > { %2599 = vmatmul.msk.f32.gmra.mxu0 %vm728_vm2, %v3198_v32 }
 0x404   : > { %2600 = vmatmul.msk.f32.gmra.mxu0 %vm728_vm2, %v3203_v33 }
 0x40c   : > { %2601 = vmatmul.msk.f32.gmra.mxu0 %vm728_vm2, %v3208_v34 }
 0x414   : > { %2602 = vmatmul.msk.f32.gmra.mxu0 %vm728_vm2, %v3213_v35 }
 0x41c   : > { %2603 = vmatmul.msk.f32.gmra.mxu0 %vm728_vm2, %v3230_v40 }
 0x424   : > { %2604 = vmatmul.msk.f32.gmra.mxu0 %vm728_vm2, %v3235_v41 }
 0x42c   : > { %2621 = vmatmul.msk.f32.vlgmr.msrb.gmra.mxu0 %vm1554_vm6, %v1454_v19 }
 0x42d   : > { %v1487_v36 = vpop.f32.mrf.mxu2 }
 0x42e   : > { %2605 = vmatmul.msk.f32.vlgmr.msra.gmra.mxu2 %vm1554_vm6, %v1487_v36 }
 0x434   : > { %2622 = vmatmul.msk.f32.gmra.mxu0 %vm1554_vm6, %v1455_v43 }
 0x435   : > { %v1490_v48 = vpop.f32.mrf.mxu2 }
 0x436   : > { %2606 = vmatmul.msk.f32.gmra.mxu2 %vm1554_vm6, %v1490_v48  ;;  %v3697_v48 = vld [vmem:[%s4064_s12] ss:$0 sm:$0xff] }
 0x43c   : > { %2623 = vmatmul.msk.f32.gmra.mxu0 %vm1554_vm6, %v1456_v50 }
 0x43d   : > { %v1493_v51 = vpop.f32.mrf.mxu2 }
 0x43e   : > { %2607 = vmatmul.msk.f32.gmra.mxu2 %vm1554_vm6, %v1493_v51 }
 0x444   : > { %2624 = vmatmul.msk.f32.gmra.mxu0 %vm1554_vm6, %v1457_v53 }
 0x445   : > { %v1496_v55 = vpop.f32.mrf.mxu2 }
 0x446   : > { %2608 = vmatmul.msk.f32.gmra.mxu2 %vm1554_vm6, %v1496_v55 }
 0x44c   : > { %2625 = vmatmul.msk.f32.gmra.mxu0 %vm1554_vm6, %v1458_v58 }
 0x44d   : > { %v1499_v59 = vpop.f32.mrf.mxu2 }
 0x44e   : > { %2609 = vmatmul.msk.f32.gmra.mxu2 %vm1554_vm6, %v1499_v59 }
 0x454   : > { %2626 = vmatmul.msk.f32.gmra.mxu0 %vm1554_vm6, %v1459_v60 }
 0x455   : > { %v1502_v21 = vpop.f32.mrf.mxu2 }
 0x456   : > { %2610 = vmatmul.msk.f32.gmra.mxu2 %vm1554_vm6, %v1502_v21 }
 0x45c   : > { %2627 = vmatmul.msk.f32.gmra.mxu0 %vm1554_vm6, %v1460_v47 }
 0x45d   : > { %v1505_v61 = vpop.f32.mrf.mxu2 }
 0x45e   : > { %2611 = vmatmul.msk.f32.gmra.mxu2 %vm1554_vm6, %v1505_v61 }
 0x464   : > { %2628 = vmatmul.msk.f32.gmra.mxu0 %vm1554_vm6, %v1461_v45 }
 0x465   : > { %v1508_v62 = vpop.f32.mrf.mxu2 }
 0x466   : > { %2612 = vmatmul.msk.f32.gmra.mxu2 %vm1554_vm6, %v1508_v62 }
 0x469   : > { %v1528_v44 = vpop.f32.mrf.mxu0 }
 0x46c   : > { %2629 = vmatmul.msk.f32.gmra.mxu0 %vm1554_vm6, %v1462_v63 }
 0x46e   : > { %2613 = vmatmul.msk.f32.gmra.mxu2 %vm1554_vm6, %v1528_v44 }
 0x471   : > { %v1531_v42 = vpop.f32.mrf.mxu0 }
 0x474   : > { %2630 = vmatmul.msk.f32.gmra.mxu0 %vm1554_vm6, %v1463_v0 }
 0x476   : > { %2614 = vmatmul.msk.f32.gmra.mxu2 %vm1554_vm6, %v1531_v42 }
 0x479   : > { %v1534_v37 = vpop.f32.mrf.mxu0 }
 0x47c   : > { %2631 = vmatmul.msk.f32.gmra.mxu0 %vm1554_vm6, %v1464_v3 }
 0x47e   : > { %2615 = vmatmul.msk.f32.gmra.mxu2 %vm1554_vm6, %v1534_v37 }
 0x481   : > { %v1537_v57 = vpop.f32.mrf.mxu0 }
 0x484   : > { %2632 = vmatmul.msk.f32.gmra.mxu0 %vm1554_vm6, %v1465_v20 }
 0x486   : > { %2616 = vmatmul.msk.f32.gmra.mxu2 %vm1554_vm6, %v1537_v57 }
 0x489   : > { %v1540_v56 = vpop.f32.mrf.mxu0 }
 0x48c   : > { %2633 = vmatmul.msk.f32.gmra.mxu0 %vm1554_vm6, %v1466_v4 }
 0x48e   : > { %2617 = vmatmul.msk.f32.gmra.mxu2 %vm1554_vm6, %v1540_v56 }
 0x491   : > { %v1543_v54 = vpop.f32.mrf.mxu0 }
 0x494   : > { %2634 = vmatmul.msk.f32.gmra.mxu0 %vm1554_vm6, %v1467_v5 }
 0x496   : > { %2618 = vmatmul.msk.f32.gmra.mxu2 %vm1554_vm6, %v1543_v54 }
 0x499   : > { %v1546_v52 = vpop.f32.mrf.mxu0 }
 0x49c   : > { %2635 = vmatmul.msk.f32.gmra.mxu0 %vm1554_vm6, %v1468_v7 }
 0x49e   : > { %2619 = vmatmul.msk.f32.gmra.mxu2 %vm1554_vm6, %v1546_v52 }
 0x4a1   : > { %v1549_v49 = vpop.f32.mrf.mxu0 }
 0x4a4   : > { %2636 = vmatmul.msk.f32.gmra.mxu0 %vm1554_vm6, %v1469_v10 }
 0x4a6   : > { %2620 = vmatmul.msk.f32.gmra.mxu2 %vm1554_vm6, %v1549_v49 }
 0x4a9   : > { %v1733_v46 = vpop.f32.mrf.mxu0 }
 0x4b1   : > { %v1620_v11 = vpop.f32.mrf.mxu2  ;;  %v1736_v13 = vpop.f32.mrf.mxu0 }
 0x4b2   : > { %v1734_v16 = vadd.f32 %v1733_v46, %v1620_v11 }
 0x4b4   : > { %v3739_v3 = vadd.f32 %v3697_v48, %v1734_v16 }
 0x4b6   : > { %vm1801_vm14 = vcmp.ge.f32.partialorder %v3739_v3, 0.0 }
 0x4b9   : > { %v1623_v1 = vpop.f32.mrf.mxu2  ;;  %v1739_v38 = vpop.f32.mrf.mxu0 }
 0x4ba   : > { %v1737_v44 = vadd.f32 %v1736_v13, %v1623_v1 }
 0x4bc   : > { %v3732_v37 = vadd.f32 %v3697_v48, %v1737_v44 }
 0x4be   : > { %vm1802_vm13 = vcmp.ge.f32.partialorder %v3732_v37, 0.0 }
 0x4c1   : > { %v1626_v8 = vpop.f32.mrf.mxu2  ;;  %v1742_v14 = vpop.f32.mrf.mxu0 }
 0x4c2   : > { %v1740_v47 = vadd.f32 %v1739_v38, %v1626_v8 }
 0x4c4   : > { %v3725_v0 = vadd.f32 %v3697_v48, %v1740_v47 }
 0x4c6   : > { %vm1803_vm12 = vcmp.ge.f32.partialorder %v3725_v0, 0.0 }
 0x4c9   : > { %v1629_v9 = vpop.f32.mrf.mxu2  ;;  %v1745_v12 = vpop.f32.mrf.mxu0 }
 0x4ca   : > { %v1743_v59 = vadd.f32 %v1742_v14, %v1629_v9 }
 0x4cc   : > { %v3718_v63 = vadd.f32 %v3697_v48, %v1743_v59 }
 0x4ce   : > { %vm1804_vm11 = vcmp.ge.f32.partialorder %v3718_v63, 0.0 }
 0x4d1   : > { %v1632_v15 = vpop.f32.mrf.mxu2  ;;  %v1748_v17 = vpop.f32.mrf.mxu0 }
 0x4d2   : > { %v1746_v53 = vadd.f32 %v1745_v12, %v1632_v15 }
 0x4d4   : > { %v3711_v61 = vadd.f32 %v3697_v48, %v1746_v53 }
 0x4d6   : > { %vm1805_vm10 = vcmp.ge.f32.partialorder %v3711_v61, 0.0 }
 0x4d9   : > { %v1635_v2 = vpop.f32.mrf.mxu2  ;;  %v1751_v18 = vpop.f32.mrf.mxu0 }
 0x4da   : > { %v1749_v50 = vadd.f32 %v1748_v17, %v1635_v2  ;;  %v1907_v2 = vld [vmem:[%s4065_s13] sm:$0xff] }
 0x4dc   : > { %v3704_v60 = vadd.f32 %v3697_v48, %v1749_v50 }
 0x4de   : > { %vm1806_vm9 = vcmp.ge.f32.partialorder %v3704_v60, 0.0 }
 0x4e1   : > { %v1638_v39 = vpop.f32.mrf.mxu2  ;;  %v1754_v6 = vpop.f32.mrf.mxu0 }
 0x4e2   : > { %v1752_v19 = vadd.f32 %v1751_v18, %v1638_v39  ;;  %v1812_v18 = vsel %vm1804_vm11, %v3718_v63, 0.0 }
 0x4e4   : > { %v3700_v55 = vadd.f32 %v3697_v48, %v1752_v19 }
 0x4e6   : > { %vm1807_vm8 = vcmp.ge.f32.partialorder %v3700_v55, 0.0 }
 0x4e9   : > { %v1641_v36 = vpop.f32.mrf.mxu2  ;;  %v1757_v43 = vpop.f32.mrf.mxu0 }
 0x4ea   : > { %v1755_v51 = vadd.f32 %v1754_v6, %v1641_v36  ;;  %v1813_v6 = vsel %vm1805_vm10, %v3711_v61, 0.0  ;;  %v1814_v36 = vsel %vm1806_vm9, %v3704_v60, 0.0 }
 0x4ec   : > { %v1792_v58 = vadd.f32 %v3697_v48, %v1755_v51 }
 0x4ee   : > { %vm1808_vm7 = vcmp.ge.f32.partialorder %v1792_v58, 0.0 }
 0x4ef   : > { %2637 = vmatpush.msk.msra.mxu3 %vm1808_vm7, %v1792_v58  ;;  %v3708_v21 = vsel %vm1808_vm7, %v1792_v58, 0.0 }
 0x4f1   : > { %v1644_v45 = vpop.f32.mrf.mxu2  ;;  %v1760_v62 = vpop.f32.mrf.mxu0  ;;  %2638 = vmatpush.msk.msra.mxu3 %vm1807_vm8, %v3700_v55 }
 0x4f2   : > { %v1758_v42 = vadd.f32 %v1757_v43, %v1644_v45 }
 0x4f3   : > { %2639 = vmatpush.msk.msra.mxu3 %vm1806_vm9, %v3704_v60 }
 0x4f4   : > { %v1793_v17 = vadd.f32 %v3697_v48, %v1758_v42 }
 0x4f5   : > { %2640 = vmatpush.msk.msra.mxu3 %vm1805_vm10, %v3711_v61  ;;  %v2183_v61 = vld [vmem:[%s4111_s17 + $0x10] sm:$0xff] }
 0x4f6   : > { %v1817_v58 = vsel %vm1801_vm14, %v1793_v17, 0.0 }
 0x4f7   : > { %2641 = vmatpush.msk.msra.mxu3 %vm1804_vm11, %v3718_v63  ;;  %v2184_v63 = vld [vmem:[%s4111_s17 + $0x18] sm:$0xff] }
 0x4f8   : > { %2290 = vmatpush.msra.mxu0 %v2184_v63 }
 0x4f9   : > { %v1647_v57 = vpop.f32.mrf.mxu2  ;;  %v1763_v20 = vpop.f32.mrf.mxu0  ;;  %2642 = vmatpush.msk.msra.mxu3 %vm1803_vm12, %v3725_v0 }
 0x4fa   : > { %2291 = vmatpush.msra.mxu0 %v2183_v61 }
 0x4fb   : > { %2643 = vmatpush.msk.msra.mxu3 %vm1802_vm13, %v3732_v37 }
 0x4fd   : > { %2644 = vmatpush.msk.msra.mxu3 %vm1801_vm14, %v3739_v3 }
 0x4fe   : > { %2645 = vmatmul.msk.f32.vlgmr.msra.gmra.mxu3 %vm728_vm2, %v3141_v22 }
 0x501   : > { %v1650_v56 = vpop.f32.mrf.mxu2  ;;  %v1766_v4 = vpop.f32.mrf.mxu0 }
 0x502   : > { %v1764_v8 = vadd.f32 %v1763_v20, %v1650_v56  ;;  %v2181_v20 = vld [vmem:[%s4111_s17] sm:$0xff] }
 0x504   : > { %v3794_v12 = vadd.f32 %v3697_v48, %v1764_v8 }
 0x506   : > { %2646 = vmatmul.msk.f32.gmra.mxu3 %vm728_vm2, %v3152_v24 }
 0x509   : > { %v1653_v54 = vpop.f32.mrf.mxu2  ;;  %v1769_v5 = vpop.f32.mrf.mxu0 }
 0x50e   : > { %2647 = vmatmul.msk.f32.gmra.mxu3 %vm728_vm2, %v3144_v23 }
 0x511   : > { %v1656_v52 = vpop.f32.mrf.mxu2  ;;  %v1772_v7 = vpop.f32.mrf.mxu0 }
 0x512   : > { %v1770_v1 = vadd.f32 %v1769_v5, %v1656_v52  ;;  %v3927_v52 = vld [vmem:[%s4112_s16] ss:$0 sm:$0xff] }
 0x514   : > { %v3782_v14 = vadd.f32 %v3697_v48, %v1770_v1 }
 0x516   : > { %2648 = vmatmul.msk.f32.gmra.mxu3 %vm728_vm2, %v3155_v25 }
 0x519   : > { %v1659_v49 = vpop.f32.mrf.mxu2  ;;  %v1775_v22 = vpop.f32.mrf.mxu0 }
 0x51a   : > { %v1773_v16 = vadd.f32 %v1772_v7, %v1659_v49 }
 0x51e   : > { %2649 = vmatmul.msk.f32.gmra.mxu3 %vm728_vm2, %v3163_v26  ;;  %v1767_v26 = vadd.f32 %v1766_v4, %v1653_v54 }
 0x520   : > { %v3788_v9 = vadd.f32 %v3697_v48, %v1767_v26 }
 0x521   : > { %v1662_v10 = vpop.f32.mrf.mxu2  ;;  %v1778_v24 = vpop.f32.mrf.mxu0 }
 0x522   : > { %v1776_v11 = vadd.f32 %v1775_v22, %v1662_v10  ;;  %v1820_v44 = vsel %vm1804_vm11, %v3788_v9, 0.0 }
 0x524   : > { %v3767_v38 = vadd.f32 %v3697_v48, %v1776_v11 }
 0x526   : > { %2650 = vmatmul.msk.f32.gmra.mxu3 %vm728_vm2, %v3169_v27  ;;  %v3776_v27 = vadd.f32 %v3697_v48, %v1773_v16  ;;  %v1823_v56 = vsel %vm1807_vm8, %v3767_v38, 0.0 }
 0x529   : > { %v1665_v46 = vpop.f32.mrf.mxu2 }
 0x52a   : > { %v1779_v13 = vadd.f32 %v1778_v24, %v1665_v46 }
 0x52c   : > { %v1800_v23 = vadd.f32 %v3697_v48, %v1779_v13 }
 0x52e   : > { %2651 = vmatmul.msk.f32.gmra.mxu3 %vm728_vm2, %v3175_v28  ;;  %2653 = vmatpush.msk.msra.mxu1 %vm1808_vm7, %v1800_v23  ;;  %v3773_v25 = vsel %vm1808_vm7, %v1800_v23, 0.0  ;;  %v1761_v28 = vadd.f32 %v1760_v62, %v1647_v57  ;;  %v2182_v57 = vld [vmem:[%s4111_s17 + $0x8] sm:$0xff] }
 0x52f   : > { %2292 = vmatpush.msra.mxu0 %v2182_v57 }
 0x530   : > { %2654 = vmatpush.msk.msra.mxu1 %vm1807_vm8, %v3767_v38  ;;  %v1794_v15 = vadd.f32 %v3697_v48, %v1761_v28  ;;  %v1815_v48 = vsel %vm1807_vm8, %v3700_v55, 0.0 }
 0x531   : > { %2293 = vmatpush.msra.mxu0 %v2181_v20 }
 0x532   : > { %2655 = vmatpush.msk.msra.mxu1 %vm1806_vm9, %v3776_v27  ;;  %v1818_v47 = vsel %vm1802_vm13, %v1794_v15, 0.0 }
 0x534   : > { %2656 = vmatpush.msk.msra.mxu1 %vm1805_vm10, %v3782_v14 }
 0x536   : > { %2652 = vmatmul.msk.f32.gmra.mxu3 %vm728_vm2, %v3181_v29  ;;  %2657 = vmatpush.msk.msra.mxu1 %vm1804_vm11, %v3788_v9  ;;  %v1908_v29 = vld [vmem:[%s4065_s13 + $0x8] sm:$0xff] }
 0x538   : > { %2658 = vmatpush.msk.msra.mxu1 %vm1803_vm12, %v3794_v12 }
 0x53a   : > { %2659 = vmatpush.msk.msra.mxu1 %vm1802_vm13, %v1794_v15 }
 0x53c   : > { %2660 = vmatpush.msk.msra.mxu1 %vm1801_vm14, %v1793_v17 }
 0x53d   : > { %2661 = vmatmul.msk.f32.vlgmr.msra.gmra.mxu1 %vm728_vm2, %v3187_v30  ;;  %v1910_v30 = vld [vmem:[%s4109_s29 + $0x8] sm:$0xff] }
 0x53e   : > { %2086 = vmatpush.msrb.mxu1 %v1908_v29  ;;  %1973 = vmatpush.msrb.mxu3 %v1910_v30  ;;  %v2187_v29 = vld [vmem:[%s4113_s1 + $0x10] sm:$0xff]  ;;  %v2186_v30 = vld [vmem:[%s4113_s1 + $0x8] sm:$0xff] }
 0x540   : > { %2087 = vmatpush.msrb.mxu1 %v1907_v2 }
 0x542   : > { %2736 = vmatpush.msra.mxu1 %v2184_v63 }
 0x544   : > { %2737 = vmatpush.msra.mxu1 %v2183_v61 }
 0x545   : > { %2662 = vmatmul.msk.f32.gmra.mxu1 %vm728_vm2, %v3193_v31  ;;  %v1909_v31 = vld [vmem:[%s4110_s19] sm:$0xff] }
 0x546   : > { %1974 = vmatpush.msrb.mxu3 %v1909_v31  ;;  %2738 = vmatpush.msra.mxu1 %v2182_v57 }
 0x548   : > { %2739 = vmatpush.msra.mxu1 %v2181_v20 }
 0x54d   : > { %2663 = vmatmul.msk.f32.gmra.mxu1 %vm728_vm2, %v3198_v32  ;;  %v1809_v32 = vsel %vm1801_vm14, %v3739_v3, 0.0  ;;  %v1822_v3 = vsel %vm1806_vm9, %v3776_v27, 0.0 }
 0x555   : > { %2664 = vmatmul.msk.f32.gmra.mxu1 %vm728_vm2, %v3203_v33 }
 0x55d   : > { %2665 = vmatmul.msk.f32.gmra.mxu1 %vm728_vm2, %v3208_v34  ;;  %v1810_v34 = vsel %vm1802_vm13, %v3732_v37, 0.0  ;;  %v1821_v37 = vsel %vm1805_vm10, %v3782_v14, 0.0 }
 0x565   : > { %2666 = vmatmul.msk.f32.gmra.mxu1 %vm728_vm2, %v3213_v35 }
 0x56d   : > { %2667 = vmatmul.msk.f32.gmra.mxu1 %vm728_vm2, %v3230_v40  ;;  %v1811_v40 = vsel %vm1803_vm12, %v3725_v0, 0.0 }
 0x575   : > { %2668 = vmatmul.msk.f32.gmra.mxu1 %vm728_vm2, %v3235_v41 }
 0x57d   : > { %2685 = vmatmul.msk.f32.vlgmr.msrb.gmra.mxu1 %vm662_vm0, %v1809_v32  ;;  %v2185_v32 = vld [vmem:[%s4113_s1] sm:$0xff] }
 0x581   : > { %v1842_v33 = vpop.f32.mrf.mxu3 }
 0x582   : > { %2669 = vmatmul.msk.f32.vlgmr.msrb.gmra.mxu3 %vm662_vm0, %v1842_v33 }
 0x585   : > { %2686 = vmatmul.msk.f32.gmra.mxu1 %vm662_vm0, %v1810_v34 }
 0x589   : > { %v1845_v35 = vpop.f32.mrf.mxu3 }
 0x58a   : > { %2670 = vmatmul.msk.f32.gmra.mxu3 %vm662_vm0, %v1845_v35 }
 0x58d   : > { %2687 = vmatmul.msk.f32.gmra.mxu1 %vm662_vm0, %v1811_v40 }
 0x591   : > { %v1848_v41 = vpop.f32.mrf.mxu3 }
 0x592   : > { %2671 = vmatmul.msk.f32.gmra.mxu3 %vm662_vm0, %v1848_v41 }
 0x595   : > { %2688 = vmatmul.msk.f32.gmra.mxu1 %vm662_vm0, %v1812_v18 }
 0x599   : > { %v1851_v39 = vpop.f32.mrf.mxu3 }
 0x59a   : > { %2672 = vmatmul.msk.f32.gmra.mxu3 %vm662_vm0, %v1851_v39 }
 0x59d   : > { %2689 = vmatmul.msk.f32.gmra.mxu1 %vm662_vm0, %v1813_v6 }
 0x5a1   : > { %v1854_v19 = vpop.f32.mrf.mxu3 }
 0x5a2   : > { %2673 = vmatmul.msk.f32.gmra.mxu3 %vm662_vm0, %v1854_v19 }
 0x5a5   : > { %2690 = vmatmul.msk.f32.gmra.mxu1 %vm662_vm0, %v1814_v36 }
 0x5a9   : > { %v1857_v43 = vpop.f32.mrf.mxu3 }
 0x5aa   : > { %2674 = vmatmul.msk.f32.gmra.mxu3 %vm662_vm0, %v1857_v43 }
 0x5ad   : > { %2691 = vmatmul.msk.f32.gmra.mxu1 %vm662_vm0, %v1815_v48 }
 0x5b1   : > { %v1860_v50 = vpop.f32.mrf.mxu3 }
 0x5b2   : > { %2675 = vmatmul.msk.f32.gmra.mxu3 %vm662_vm0, %v1860_v50 }
 0x5b5   : > { %2692 = vmatmul.msk.f32.gmra.mxu1 %vm662_vm0, %v3708_v21  ;;  %v1819_v21 = vsel %vm1803_vm12, %v3794_v12, 0.0 }
 0x5b9   : > { %v1863_v51 = vpop.f32.mrf.mxu3 }
 0x5ba   : > { %v1883_v53 = vpop.f32.mrf.mxu1  ;;  %2676 = vmatmul.msk.f32.gmra.mxu3 %vm662_vm0, %v1863_v51 }
 0x5bd   : > { %2693 = vmatmul.msk.f32.gmra.mxu1 %vm662_vm0, %v1817_v58 }
 0x5c2   : > { %v1886_v59 = vpop.f32.mrf.mxu1  ;;  %2677 = vmatmul.msk.f32.gmra.mxu3 %vm662_vm0, %v1883_v53 }
 0x5c5   : > { %2694 = vmatmul.msk.f32.gmra.mxu1 %vm662_vm0, %v1818_v47 }
 0x5ca   : > { %v1889_v45 = vpop.f32.mrf.mxu1  ;;  %2678 = vmatmul.msk.f32.gmra.mxu3 %vm662_vm0, %v1886_v59 }
 0x5cd   : > { %2695 = vmatmul.msk.f32.gmra.mxu1 %vm662_vm0, %v1819_v21 }
 0x5d2   : > { %v1892_v62 = vpop.f32.mrf.mxu1  ;;  %2679 = vmatmul.msk.f32.gmra.mxu3 %vm662_vm0, %v1889_v45 }
 0x5d5   : > { %2696 = vmatmul.msk.f32.gmra.mxu1 %vm662_vm0, %v1820_v44 }
 0x5da   : > { %v1895_v42 = vpop.f32.mrf.mxu1  ;;  %2680 = vmatmul.msk.f32.gmra.mxu3 %vm662_vm0, %v1892_v62 }
 0x5dd   : > { %2697 = vmatmul.msk.f32.gmra.mxu1 %vm662_vm0, %v1821_v37 }
 0x5e2   : > { %v1898_v0 = vpop.f32.mrf.mxu1  ;;  %2681 = vmatmul.msk.f32.gmra.mxu3 %vm662_vm0, %v1895_v42 }
 0x5e5   : > { %2698 = vmatmul.msk.f32.gmra.mxu1 %vm662_vm0, %v1822_v3 }
 0x5ea   : > { %v1901_v60 = vpop.f32.mrf.mxu1  ;;  %2682 = vmatmul.msk.f32.gmra.mxu3 %vm662_vm0, %v1898_v0 }
 0x5ed   : > { %2699 = vmatmul.msk.f32.gmra.mxu1 %vm662_vm0, %v1823_v56 }
 0x5f2   : > { %v1904_v4 = vpop.f32.mrf.mxu1  ;;  %2683 = vmatmul.msk.f32.gmra.mxu3 %vm662_vm0, %v1901_v60 }
 0x5f5   : > { %2700 = vmatmul.msk.f32.gmra.mxu1 %vm662_vm0, %v3773_v25  ;;  %v2188_v25 = vld [vmem:[%s4113_s1 + $0x18] sm:$0xff] }
 0x5f6   : > { %2225 = vmatpush.msrb.mxu2 %v2188_v25 }
 0x5f8   : > { %2226 = vmatpush.msrb.mxu2 %v2187_v29 }
 0x5fa   : > { %2684 = vmatmul.msk.f32.gmra.mxu3 %vm662_vm0, %v1904_v4  ;;  %v2089_v54 = vpop.f32.mrf.mxu1  ;;  %2227 = vmatpush.msrb.mxu2 %v2186_v30 }
 0x5fc   : > { %2228 = vmatpush.msrb.mxu2 %v2185_v32 }
 0x602   : > { %v2092_v5 = vpop.f32.mrf.mxu1 }
 0x605   : > { %v1976_v55 = vpop.f32.mrf.mxu3 }
 0x606   : > { %v2090_v7 = vadd.f32 %v2089_v54, %v1976_v55 }
 0x608   : > { %v3930_v49 = vadd.f32 %v3927_v52, %v2090_v7 }
 0x60a   : > { %vm2157_vm2 = vcmp.ge.f32.partialorder %v3930_v49, 0.0  ;;  %v2095_v22 = vpop.f32.mrf.mxu1 }
 0x60b   : > { %v2165_v10 = vsel %vm2157_vm2, %v3930_v49, 0.0 }
 0x60c   : > { %2709 = vmatmul.msk.f32.vlgmr.msra.gmra.mxu0 %vm867_vm1, %v2165_v10 }
 0x60d   : > { %v1979_v24 = vpop.f32.mrf.mxu3 }
 0x60e   : > { %v2093_v46 = vadd.f32 %v2092_v5, %v1979_v24 }
 0x610   : > { %v3938_v11 = vadd.f32 %v3927_v52, %v2093_v46 }
 0x612   : > { %v2098_v13 = vpop.f32.mrf.mxu1  ;;  %vm2158_vm0 = vcmp.ge.f32.partialorder %v3938_v11, 0.0 }
 0x613   : > { %v2166_v16 = vsel %vm2158_vm0, %v3938_v11, 0.0 }
 0x614   : > { %2710 = vmatmul.msk.f32.gmra.mxu0 %vm867_vm1, %v2166_v16 }
 0x615   : > { %v1982_v23 = vpop.f32.mrf.mxu3 }
 0x616   : > { %v2096_v1 = vadd.f32 %v2095_v22, %v1982_v23 }
 0x618   : > { %v3946_v38 = vadd.f32 %v3927_v52, %v2096_v1 }
 0x61a   : > { %v2101_v26 = vpop.f32.mrf.mxu1  ;;  %vm2159_vm15 = vcmp.ge.f32.partialorder %v3946_v38, 0.0 }
 0x61b   : > { %v2167_v27 = vsel %vm2159_vm15, %v3946_v38, 0.0 }
 0x61c   : > { %2711 = vmatmul.msk.f32.gmra.mxu0 %vm867_vm1, %v2167_v27 }
 0x61d   : > { %v1985_v8 = vpop.f32.mrf.mxu3 }
 0x61e   : > { %v2099_v14 = vadd.f32 %v2098_v13, %v1985_v8 }
 0x620   : > { %v2144_v28 = vadd.f32 %v3927_v52, %v2099_v14 }
 0x622   : > { %v2104_v9 = vpop.f32.mrf.mxu1  ;;  %vm2160_vm3 = vcmp.ge.f32.partialorder %v2144_v28, 0.0 }
 0x623   : > { %v2168_v12 = vsel %vm2160_vm3, %v2144_v28, 0.0 }
 0x624   : > { %2712 = vmatmul.msk.f32.gmra.mxu0 %vm867_vm1, %v2168_v12 }
 0x625   : > { %v1988_v15 = vpop.f32.mrf.mxu3 }
 0x626   : > { %v2102_v17 = vadd.f32 %v2101_v26, %v1988_v15 }
 0x628   : > { %v2145_v2 = vadd.f32 %v3927_v52, %v2102_v17 }
 0x62a   : > { %v2107_v31 = vpop.f32.mrf.mxu1  ;;  %vm2161_vm4 = vcmp.ge.f32.partialorder %v2145_v2, 0.0 }
 0x62b   : > { %v2169_v33 = vsel %vm2161_vm4, %v2145_v2, 0.0 }
 0x62c   : > { %2713 = vmatmul.msk.f32.gmra.mxu0 %vm867_vm1, %v2169_v33 }
 0x62d   : > { %v1991_v34 = vpop.f32.mrf.mxu3 }
 0x62e   : > { %v2105_v35 = vadd.f32 %v2104_v9, %v1991_v34 }
 0x630   : > { %v2146_v40 = vadd.f32 %v3927_v52, %v2105_v35 }
 0x632   : > { %v2110_v41 = vpop.f32.mrf.mxu1  ;;  %vm2162_vm5 = vcmp.ge.f32.partialorder %v2146_v40, 0.0 }
 0x633   : > { %v2170_v18 = vsel %vm2162_vm5, %v2146_v40, 0.0 }
 0x634   : > { %2714 = vmatmul.msk.f32.gmra.mxu0 %vm867_vm1, %v2170_v18 }
 0x635   : > { %v1994_v39 = vpop.f32.mrf.mxu3 }
 0x636   : > { %v2108_v6 = vadd.f32 %v2107_v31, %v1994_v39 }
 0x638   : > { %v2147_v19 = vadd.f32 %v3927_v52, %v2108_v6 }
 0x63a   : > { %v2113_v36 = vpop.f32.mrf.mxu1  ;;  %vm2163_vm6 = vcmp.ge.f32.partialorder %v2147_v19, 0.0 }
 0x63b   : > { %v2171_v43 = vsel %vm2163_vm6, %v2147_v19, 0.0 }
 0x63c   : > { %2715 = vmatmul.msk.f32.gmra.mxu0 %vm867_vm1, %v2171_v43 }
 0x63d   : > { %v1997_v48 = vpop.f32.mrf.mxu3 }
 0x63e   : > { %v2111_v50 = vadd.f32 %v2110_v41, %v1997_v48 }
 0x640   : > { %v2148_v51 = vadd.f32 %v3927_v52, %v2111_v50 }
 0x642   : > { %vm2164_vm7 = vcmp.ge.f32.partialorder %v2148_v51, 0.0  ;;  %v2116_v53 = vpop.f32.mrf.mxu1 }
 0x643   : > { %v2172_v58 = vsel %vm2164_vm7, %v2148_v51, 0.0 }
 0x644   : > { %2716 = vmatmul.msk.f32.vlgmr.msra.gmra.mxu1 %vm867_vm1, %v2172_v58 }
 0x645   : > { %v2000_v59 = vpop.f32.mrf.mxu3 }
 0x646   : > { %v2114_v47 = vadd.f32 %v2113_v36, %v2000_v59 }
 0x648   : > { %v2149_v45 = vadd.f32 %v3927_v52, %v2114_v47 }
 0x64a   : > { %v2173_v21 = vsel %vm2157_vm2, %v2149_v45, 0.0  ;;  %v2119_v62 = vpop.f32.mrf.mxu1 }
 0x64b   : > { %2701 = vmatmul.msk.f32.vlgmr.msrb.gmra.mxu2 %vm867_vm1, %v2173_v21 }
 0x64d   : > { %v2003_v44 = vpop.f32.mrf.mxu3 }
 0x64e   : > { %v2117_v42 = vadd.f32 %v2116_v53, %v2003_v44 }
 0x650   : > { %v2150_v37 = vadd.f32 %v3927_v52, %v2117_v42 }
 0x652   : > { %v2174_v0 = vsel %vm2158_vm0, %v2150_v37, 0.0  ;;  %v2122_v3 = vpop.f32.mrf.mxu1 }
 0x653   : > { %2702 = vmatmul.msk.f32.gmra.mxu2 %vm867_vm1, %v2174_v0 }
 0x655   : > { %v2006_v63 = vpop.f32.mrf.mxu3 }
 0x656   : > { %v2120_v61 = vadd.f32 %v2119_v62, %v2006_v63 }
 0x658   : > { %v2151_v57 = vadd.f32 %v3927_v52, %v2120_v61 }
 0x65a   : > { %v2175_v60 = vsel %vm2159_vm15, %v2151_v57, 0.0  ;;  %v2125_v4 = vpop.f32.mrf.mxu1 }
 0x65b   : > { %2703 = vmatmul.msk.f32.gmra.mxu2 %vm867_vm1, %v2175_v60 }
 0x65d   : > { %v2009_v20 = vpop.f32.mrf.mxu3 }
 0x65e   : > { %v2123_v56 = vadd.f32 %v2122_v3, %v2009_v20 }
 0x660   : > { %v2152_v54 = vadd.f32 %v3927_v52, %v2123_v56 }
 0x662   : > { %v2176_v5 = vsel %vm2160_vm3, %v2152_v54, 0.0  ;;  %v2128_v22 = vpop.f32.mrf.mxu1 }
 0x663   : > { %2704 = vmatmul.msk.f32.gmra.mxu2 %vm867_vm1, %v2176_v5 }
 0x665   : > { %v2012_v55 = vpop.f32.mrf.mxu3 }
 0x666   : > { %v2126_v7 = vadd.f32 %v2125_v4, %v2012_v55 }
 0x668   : > { %v2153_v49 = vadd.f32 %v3927_v52, %v2126_v7 }
 0x66a   : > { %v2177_v10 = vsel %vm2161_vm4, %v2153_v49, 0.0  ;;  %v2131_v16 = vpop.f32.mrf.mxu1 }
 0x66b   : > { %2705 = vmatmul.msk.f32.gmra.mxu2 %vm867_vm1, %v2177_v10 }
 0x66d   : > { %v2015_v24 = vpop.f32.mrf.mxu3 }
 0x66e   : > { %v2129_v46 = vadd.f32 %v2128_v22, %v2015_v24 }
 0x670   : > { %v2154_v11 = vadd.f32 %v3927_v52, %v2129_v46 }
 0x672   : > { %v2178_v13 = vsel %vm2162_vm5, %v2154_v11, 0.0  ;;  %v2134_v26 = vpop.f32.mrf.mxu1 }
 0x673   : > { %2706 = vmatmul.msk.f32.gmra.mxu2 %vm867_vm1, %v2178_v13 }
 0x675   : > { %v2018_v23 = vpop.f32.mrf.mxu3 }
 0x676   : > { %v2132_v1 = vadd.f32 %v2131_v16, %v2018_v23 }
 0x678   : > { %v2155_v38 = vadd.f32 %v3927_v52, %v2132_v1 }
 0x67a   : > { %v2179_v25 = vsel %vm2163_vm6, %v2155_v38, 0.0 }
 0x67b   : > { %2707 = vmatmul.msk.f32.gmra.mxu2 %vm867_vm1, %v2179_v25 }
 0x67d   : > { %v2021_v27 = vpop.f32.mrf.mxu3 }
 0x67e   : > { %v2135_v8 = vadd.f32 %v2134_v26, %v2021_v27 }
 0x680   : > { %v2156_v14 = vadd.f32 %v3927_v52, %v2135_v8 }
 0x682   : > { %v2180_v28 = vsel %vm2164_vm7, %v2156_v14, 0.0 }
 0x683   : > { %2708 = vmatmul.msk.f32.gmra.mxu2 %vm867_vm1, %v2180_v28 }
 0x689   : > { %v2295_v9 = vpop.f32.mrf.mxu0 }
 0x691   : > { %v2298_v12 = vpop.f32.mrf.mxu0 }
 0x699   : > { %v2301_v29 = vpop.f32.mrf.mxu0 }
 0x6a1   : > { %v2304_v32 = vpop.f32.mrf.mxu0 }
 0x6a9   : > { %v2307_v35 = vpop.f32.mrf.mxu0 }
 0x6b1   : > { %v2310_v18 = vpop.f32.mrf.mxu0 }
 0x6b9   : > { %v2313_v19 = vpop.f32.mrf.mxu0 }
 0x6c1   : > { %v2316_v48 = vpop.f32.mrf.mxu1 }
 0x6ce   : > { %v2230_v15 = vpop.f32.mrf.mxu2 }
 0x6cf   : > { %v2296_v17 = vadd.f32 %v2295_v9, %v2230_v15 }
 0x6d1   : > { %2319 = vst [vmem:[%s4009_s25] sm:$0xff] %v2296_v17 }
 0x6d6   : > { %v2233_v2 = vpop.f32.mrf.mxu2 }
 0x6d7   : > { %v2299_v52 = vadd.f32 %v2298_v12, %v2233_v2 }
 0x6d9   : > { %2320 = vst [vmem:[%s4009_s25 + $0x8] sm:$0xff] %v2299_v52 }
 0x6de   : > { %v2236_v30 = vpop.f32.mrf.mxu2 }
 0x6df   : > { %v2302_v31 = vadd.f32 %v2301_v29, %v2236_v30 }
 0x6e1   : > { %2321 = vst [vmem:[%s4009_s25 + $0x10] sm:$0xff] %v2302_v31 }
 0x6e6   : > { %v2239_v33 = vpop.f32.mrf.mxu2 }
 0x6e7   : > { %v2305_v34 = vadd.f32 %v2304_v32, %v2239_v33 }
 0x6e9   : > { %2322 = vst [vmem:[%s4009_s25 + $0x18] sm:$0xff] %v2305_v34 }
 0x6ee   : > { %v2242_v40 = vpop.f32.mrf.mxu2 }
 0x6ef   : > { %v2308_v41 = vadd.f32 %v2307_v35, %v2242_v40 }
 0x6f1   : > { %2323 = vst [vmem:[%s4009_s25 + $0x20] sm:$0xff] %v2308_v41 }
 0x6f6   : > { %v2245_v39 = vpop.f32.mrf.mxu2 }
 0x6f7   : > { %v2311_v6 = vadd.f32 %v2310_v18, %v2245_v39 }
 0x6f9   : > { %2324 = vst [vmem:[%s4009_s25 + $0x28] sm:$0xff] %v2311_v6 }
 0x6fe   : > { %v2248_v36 = vpop.f32.mrf.mxu2 }
 0x6ff   : > { %v2314_v43 = vadd.f32 %v2313_v19, %v2248_v36 }
 0x701   : > { %2325 = vst [vmem:[%s4009_s25 + $0x30] sm:$0xff] %v2314_v43 }
 0x706   : > { %v2251_v50 = vpop.f32.mrf.mxu2 }
 0x707   : > { %v2317_v51 = vadd.f32 %v2316_v48, %v2251_v50 }
 0x709   : > { %2326 = vst [vmem:[%s4009_s25 + $0x38] sm:$0xff] %v2317_v51 }
 0x70a   : > { %2851 = shalt.err (!%p2848_p5)
}
 0x70b   : > { %s2894_s20 = smov 128   ;;  %s2895_s25 = smov 8  }
 0x70c   : > { %2742 = dma.vmem_to_hbm [thread:$0]  (%p3040_p10), %s2341_s2, 1024, %s2343_s14, %s2328_s15, %s2894_s20, %s2894_s20, %s2895_s25  }
 0x70d PF: > { %s4117_s1 = sld [smem:[#allocation8_spill]]  ;;  %p2753_p7 = scmp.ge.s32.totalorder %s2890_s30, 2 }
 0x70f   : > { %p2749_p8 = pnand %p2753_p7, %p3044_p11 }
 0x711   : > { %p2750_p9 = pneg %p2749_p8 }
 0x713   : > { %s2357_s29 = sand.u32 1, %s4117_s1  }
 0x714   : > { %s2358_s16 = scalar_lea.sflag [#allocation4], %s2357_s29 }
 0x715   : > { %2873 = dma.done.wait (%p2750_p9), %s2358_s16, 1024  }
 0x716   : > { %2875 = vsyncadd (%p2750_p9), %s2358_s16, 4294966272  ;;  %s4119_s30 = sld [smem:[#allocation10_spill]]  ;;  %s4122_s27 = smov %s2882_s28 }
 0x717   : > { %s4120_s26 = sld [smem:[#allocation9_spill]] }
 0x718   : > { %s4121_s29 = sld [smem:[#allocation11_spill]] }
 0x71c   : > { %p31_p1 = scmp.ge.s32.totalorder %s4119_s30, 6  }
 0x71d   : > { %s4123_s28 = smov %s4120_s26 }
 0x71e   :  { %33 = sbr.rel (!%p31_p1) target bundleno = 15 (0xf), region = 143 }
 0x723   :  { %2364 = vsyncpa [#allocation3], 1 }
 0x724   :  { %2366 = vsyncpa [#allocation3 + $0x1], 1 }
 0x725   :  { %2367 = vsyncpa [#allocation4], 1 }
 0x726   :  { %2369 = vsyncpa [#allocation4 + $0x1], 1 }

</bundles_post_ra>
